<compile_context>
chip_gen: v7x
topology: tpu7x:2x2x1
jax: 0.10.0
libtpu: 0.0.40
codegen_flags: <defaults>
</compile_context>

<pallas_src>
import math
import functools

import jax
import jax.numpy as jnp
from jax.experimental import pallas as pl
from jax.experimental.pallas import tpu as pltpu

# ----------------------------- configuration --------------------------------
C_S = 32        # single-rep channels
C_Z = 8         # pair-rep channels
N_QP = 4        # query points
N_PV = 8        # value points
N_HEAD = 4      # heads (module default is 12; kept small for the example)
C = 16          # per-head channels
N_RES = 16      # residues


# --------------------------- Pallas kernels ---------------------------------
def _linear_kernel(x_ref, w_ref, b_ref, o_ref):
    # o = x @ w + b ; bf16 MXU operands, f32 accumulation.
    x = x_ref[...].astype(jnp.bfloat16)
    w = w_ref[...].astype(jnp.bfloat16)
    o_ref[...] = (
        jnp.dot(x, w, preferred_element_type=jnp.float32) + b_ref[...]
    )


def pallas_linear(x, w, b, block_m=128):
    """x: (M, K) @ w: (K, N) + b: (N,) -> (M, N); tiled over M ("parallel")."""
    m, k = x.shape
    n = w.shape[1]
    bm = m if m <= block_m else block_m
    assert m % bm == 0, (m, bm)
    return pl.pallas_call(
        _linear_kernel,
        out_shape=jax.ShapeDtypeStruct((m, n), jnp.float32),
        grid_spec=pltpu.PrefetchScalarGridSpec(
            num_scalar_prefetch=0,
            grid=(m // bm,),
            in_specs=[
                pl.BlockSpec((bm, k), lambda i: (i, 0)),
                pl.BlockSpec((k, n), lambda i: (0, 0)),
                pl.BlockSpec((1, n), lambda i: (0, 0)),
            ],
            out_specs=pl.BlockSpec((bm, n), lambda i: (i, 0)),
        ),
        compiler_params=pltpu.CompilerParams(
            dimension_semantics=("parallel",)),
    )(x, w, b.reshape(1, n))


def _ipa_attention_kernel(gamma_ref,                       # SMEM (N_head,) scalar prefetch
                          qkv_ref,                         # (N, 3*H*c)  [q | k | v]
                          tqp_ref, tkp_ref,                # (H, N, 3*n_qp) warped points
                          tvp_ref,                         # (H, N, 3*n_pv)
                          bias_ref,                        # (H, N, N) pair bias
                          zt_ref,                          # (N, c_z, N) pair rep (i, c, j)
                          out_ref,                         # (N, H*(c + 3*n_pv + c_z))
                          *, n_head, c, n_qp, n_pv, c_z):
    wc = math.sqrt(2.0 / (9.0 * n_qp))
    wl = math.sqrt(1.0 / 3.0)
    inv_sqrt_c = 1.0 / math.sqrt(c)
    ct = (((1,), (1,)), ((), ()))      # contract last dims: A @ B^T
    cn = (((1,), (0,)), ((), ()))      # standard matmul:   A @ B

    n = qkv_ref.shape[0]
    d_c = n_head * c

    # Load once; everything fits comfortably in VMEM/vregs at these sizes.
    qkv = qkv_ref[...]
    tqp_all = tqp_ref[...]
    tkp_all = tkp_ref[...]
    tvp_all = tvp_ref[...]
    bias_all = bias_ref[...]
    zt = zt_ref[...]
    ones_col = jnp.ones((n, 1), jnp.float32)

    v_parts, p_parts, z_parts = [], [], []
    for h in range(n_head):                                # unrolled, H small
        gw = gamma_ref[h] * wc                             # softplus(head_w)[h]*wc
        q_h = qkv[:, h * c:(h + 1) * c] * inv_sqrt_c
        k_h = qkv[:, d_c + h * c: d_c + (h + 1) * c]
        v_h = qkv[:, 2 * d_c + h * c: 2 * d_c + (h + 1) * c]
        tqp_h = tqp_all[h]                                 # (N, 3*n_qp)
        tkp_h = tkp_all[h]
        tvp_h = tvp_all[h]                                 # (N, 3*n_pv)

        sq_q = jnp.sum(tqp_h * tqp_h, axis=-1, keepdims=True)   # (N, 1)
        sq_k = jnp.sum(tkp_h * tkp_h, axis=-1, keepdims=True)   # (N, 1)

        # One fused MXU matmul for q.k + gamma*wc*qp.kp - gamma*wc/2*|kp|^2[j]
        lhs = jnp.concatenate([q_h, gw * tqp_h, ones_col], axis=-1)
        rhs = jnp.concatenate([k_h, tkp_h, (-0.5 * gw) * sq_k], axis=-1)
        core = jax.lax.dot_general(
            lhs.astype(jnp.bfloat16), rhs.astype(jnp.bfloat16), ct,
            preferred_element_type=jnp.float32)                  # (N, N)

        logits = wl * (core + bias_all[h] - (0.5 * gw) * sq_q)
        logits = logits - jnp.max(logits, axis=-1, keepdims=True)
        e = jnp.exp(logits)
        att = e * pl.reciprocal(jnp.sum(e, axis=-1, keepdims=True), approx=True)

        # Fused value / value-point aggregation (one matmul per head).
        vals = jnp.concatenate([v_h, tvp_h], axis=-1)            # (N, c+3*n_pv)
        av = jax.lax.dot_general(
            att.astype(jnp.bfloat16), vals.astype(jnp.bfloat16), cn,
            preferred_element_type=jnp.float32)                  # (N, c+3*n_pv)

        # Pair output: sum_j att[i, j] * z[i, j, :]  (z supplied as (i, c_z, j)).
        # TODO(synk): at production N_res, j-tile this term (and the z_t block)
        # and lower it to an MXU dot per tile instead of a full-row broadcast +
        # XLU lane reduce (vreg-pressure / v7x VMEM concern from the review).
        pair = jnp.sum(att[:, None, :] * zt, axis=-1)            # (N, c_z)

        v_parts.append(av[:, :c])
        p_parts.append(av[:, c:])
        z_parts.append(pair)

    # Single lane-dense store: [v (all heads) | v_pts (all heads) | pair (all heads)]
    out_ref[...] = jnp.concatenate(v_parts + p_parts + z_parts, axis=-1)


def ipa_attention(gamma, qkv, tqp, tkp, tvp, bias, z_t):
    n_head, n_res, d_qp = tqp.shape
    d_vp = tvp.shape[-1]
    c = qkv.shape[-1] // (3 * n_head)
    c_z = z_t.shape[1]
    d_out = n_head * (c + d_vp + c_z)

    grid_spec = pltpu.PrefetchScalarGridSpec(
        num_scalar_prefetch=1,                 # gamma lands in SMEM
        grid=(1,),                             # single invocation, heads unrolled inside
        in_specs=[
            pl.BlockSpec((n_res, 3 * n_head * c), lambda i, g: (0, 0)),      # qkv
            pl.BlockSpec((n_head, n_res, d_qp), lambda i, g: (0, 0, 0)),     # warped q-points
            pl.BlockSpec((n_head, n_res, d_qp), lambda i, g: (0, 0, 0)),     # warped k-points
            pl.BlockSpec((n_head, n_res, d_vp), lambda i, g: (0, 0, 0)),     # warped v-points
            pl.BlockSpec((n_head, n_res, n_res), lambda i, g: (0, 0, 0)),    # pair bias
            pl.BlockSpec((n_res, c_z, n_res), lambda i, g: (0, 0, 0)),       # z (i, c_z, j)
        ],
        out_specs=pl.BlockSpec((n_res, d_out), lambda i, g: (0, 0)),
    )
    return pl.pallas_call(
        functools.partial(_ipa_attention_kernel, n_head=n_head, c=c,
                          n_qp=d_qp // 3, n_pv=d_vp // 3, c_z=c_z),
        grid_spec=grid_spec,
        out_shape=jax.ShapeDtypeStruct((n_res, d_out), jnp.float32),
        compiler_params=pltpu.CompilerParams(dimension_semantics=("arbitrary",)),
    )(gamma, qkv, tqp, tkp, tvp, bias, z_t)


# ------------------------------ parameters ----------------------------------
def init_params(key):
    def lin(k, fan_in, fan_out):
        kw, kb = jax.random.split(k)
        w = jax.random.normal(kw, (fan_in, fan_out), jnp.float32) / math.sqrt(fan_in)
        b = 0.1 * jax.random.normal(kb, (fan_out,), jnp.float32)
        return w, b

    ks = jax.random.split(key, 8)
    p = {}
    p["wq"],  p["bq"]  = lin(ks[0], C_S, N_HEAD * C)
    p["wk"],  p["bk"]  = lin(ks[1], C_S, N_HEAD * C)
    p["wv"],  p["bv"]  = lin(ks[2], C_S, N_HEAD * C)
    p["wqp"], p["bqp"] = lin(ks[3], C_S, 3 * N_QP * N_HEAD)
    p["wkp"], p["bkp"] = lin(ks[4], C_S, 3 * N_QP * N_HEAD)
    p["wvp"], p["bvp"] = lin(ks[5], C_S, 3 * N_PV * N_HEAD)
    p["wb"],  p["bb"]  = lin(ks[6], C_Z, N_HEAD)
    d_cat = N_HEAD * C_Z + N_HEAD * C + N_HEAD * 4 * N_PV
    p["wo"],  p["bo"]  = lin(ks[7], d_cat, C_S)
    # nn.Parameter(torch.zeros(N_head)) in the module; use a deterministic
    # non-trivial setting so each head gets a distinct gamma = softplus(w).
    p["head_weights"] = jnp.linspace(-0.5, 0.5, N_HEAD).astype(jnp.float32)
    return p


# ------------------------------ forward pass ---------------------------------
def ipa_forward(params, s, z, T):
    n_res = s.shape[0]
    d_c = N_HEAD * C
    d_qp = 3 * N_QP * N_HEAD
    d_vp3 = 3 * N_PV * N_HEAD

    # ---- fused input projections (one tiled Pallas matmul) ----
    w_all = jnp.concatenate(
        [params["wq"], params["wk"], params["wv"],
         params["wqp"], params["wkp"], params["wvp"]], axis=1)
    b_all = jnp.concatenate(
        [params["bq"], params["bk"], params["bv"],
         params["bqp"], params["bkp"], params["bvp"]])
    proj = pallas_linear(s, w_all, b_all)                      # (N_res, 384)

    qkv = proj[:, :3 * d_c]                                    # (N, 3*H*C), head-blocked
    pqp = proj[:, 3 * d_c: 3 * d_c + d_qp]
    pkp = proj[:, 3 * d_c + d_qp: 3 * d_c + 2 * d_qp]
    pvp = proj[:, 3 * d_c + 2 * d_qp:]

    # point embeddings: (N_head, P, N_res, 3)
    qp = pqp.reshape(n_res, 3, N_HEAD, N_QP).transpose(2, 3, 0, 1)
    kp = pkp.reshape(n_res, 3, N_HEAD, N_QP).transpose(2, 3, 0, 1)
    vp = pvp.reshape(n_res, 3, N_HEAD, N_PV).transpose(2, 3, 0, 1)

    # ---- pair bias (M-tiled Pallas matmul over N_res^2 rows) ----
    # TODO(synk): at production N_res fuse z @ wb into the attention kernel per
    # j-tile to avoid this lane-sparse (N^2, N_head) intermediate.
    zb = pallas_linear(z.reshape(n_res * n_res, C_Z), params["wb"], params["bb"])
    bias = zb.reshape(n_res, n_res, N_HEAD).transpose(2, 0, 1)  # (N_head, i, j)

    # ---- warp points into the global frame (O(N_res) glue) ----
    R = T[:, :3, :3]                                            # (N_res, 3, 3)
    t = T[:, :3, 3]                                             # (N_res, 3)

    def warp(pts):  # (N_head, P, N_res, 3) -> same shape, global frame
        return jnp.einsum("rxy,hpry->hprx", R, pts) + t[None, None, :, :]

    def flat(pw):   # (N_head, P, N_res, 3) -> (N_head, N_res, P*3), lanes (point, xyz)
        n_pts = pw.shape[1]
        return pw.transpose(0, 2, 1, 3).reshape(N_HEAD, n_res, n_pts * 3)

    tqp = flat(warp(qp))
    tkp = flat(warp(kp))
    tvp = flat(warp(vp))

    z_t = z.transpose(0, 2, 1)                                  # (N_res, c_z, N_res)
    gamma = jax.nn.softplus(params["head_weights"])             # (N_head,)

    # ---- attention core: one Pallas invocation, heads unrolled inside ----
    att_out = ipa_attention(gamma, qkv, tqp, tkp, tvp, bias, z_t)   # (N, H*48)

    # kernel output is already ordered [v (head-major) | v_pts | pair] -> no transposes
    o_v = att_out[:, :d_c]                                      # (N, H*C)
    o_vp = att_out[:, d_c:d_c + d_vp3]                          # (N, H*3*N_pv)
    o_pair = att_out[:, d_c + d_vp3:]                           # (N, H*c_z)

    # ---- map attended points back to local frames, norms, rearrange ----
    vp_g = o_vp.reshape(n_res, N_HEAD, N_PV, 3)                 # global-frame points
    # rigid inverse: x_local = R^T (x - t)
    v_local = jnp.einsum("ryx,rhpy->rhpx", R, vp_g - t[:, None, None, :])
    v_tr = v_local.transpose(0, 3, 1, 2)                        # (N_res, 3, N_head, N_pv)
    vp_out = v_tr.reshape(n_res, 3 * N_HEAD * N_PV)
    # eps inside the sqrt (review correctness note: keeps the gradient finite)
    vp_out_norm = jnp.sqrt(jnp.sum(v_tr * v_tr, axis=1) + 1e-12).reshape(
        n_res, N_HEAD * N_PV)

    cat = jnp.concatenate([o_v, vp_out, vp_out_norm, o_pair], axis=-1)
    return pallas_linear(cat, params["wo"], params["bo"])       # (N_res, c_s)


# --------------------------------- main --------------------------------------
if __name__ == "__main__":
    key = jax.random.PRNGKey(0)
    kparams, kdata = jax.random.split(key)
    params = init_params(kparams)

    k1, k2, k3, k4 = jax.random.split(kdata, 4)
    s = jax.random.normal(k1, (N_RES, C_S), jnp.float32)
    z = jax.random.normal(k2, (N_RES, N_RES, C_Z), jnp.float32)

    # random rigid backbone transforms (rotation via QR, random translation)
    A = jax.random.normal(k3, (N_RES, 3, 3), jnp.float32)
    Q, _ = jnp.linalg.qr(A)
    trans = jax.random.normal(k4, (N_RES, 3), jnp.float32)
    T = jnp.zeros((N_RES, 4, 4), jnp.float32)
    T = T.at[:, :3, :3].set(Q).at[:, :3, 3].set(trans).at[:, 3, 3].set(1.0)

    out = jax.jit(ipa_forward)(params, s, z, T)
    out = jax.block_until_ready(out)
    assert out.shape == (N_RES, C_S), out.shape
    assert bool(jnp.all(jnp.isfinite(out)))
    print("KERNEL_OK")
</pallas_src>

<mosaic_0001>
module attributes {stable_mosaic.version = 11 : i64} {
  func.func @_linear_kernel(%arg0: i32, %arg1: memref<16x32xf32, #tpu.memory_space<vmem>>, %arg2: memref<32x384xf32, #tpu.memory_space<vmem>>, %arg3: memref<1x384xf32, #tpu.memory_space<vmem>>, %arg4: memref<16x384xf32, #tpu.memory_space<vmem>>) attributes {dimension_semantics = [#tpu.dimension_semantics<parallel>], iteration_bounds = array<i64: 1>, scalar_prefetch = 0 : i64, scratch_operands = 0 : i64, tpu.core_type = #tpu.core_type<tc>, window_params = [{transform_indices = @transform_0, window_bounds = array<i64: 16, 32>}, {pipeline_mode = #tpu.pipeline_mode<synchronous>, transform_indices = @transform_1, window_bounds = array<i64: 32, 384>}, {pipeline_mode = #tpu.pipeline_mode<synchronous>, transform_indices = @transform_2, window_bounds = array<i64: 1, 384>}, {transform_indices = @transform_3, window_bounds = array<i64: 16, 384>}]} {
    %c0 = arith.constant 0 : index
    %c0_0 = arith.constant 0 : index
    %0 = vector.load %arg1[%c0, %c0_0] : memref<16x32xf32, #tpu.memory_space<vmem>>, vector<16x32xf32>
    %1 = arith.truncf %0 : vector<16x32xf32> to vector<16x32xbf16>
    %c0_1 = arith.constant 0 : index
    %c0_2 = arith.constant 0 : index
    %2 = vector.load %arg2[%c0_1, %c0_2] : memref<32x384xf32, #tpu.memory_space<vmem>>, vector<32x384xf32>
    %3 = arith.truncf %2 : vector<32x384xf32> to vector<32x384xbf16>
    %cst = arith.constant dense<0.000000e+00> : vector<16x384xf32>
    %4 = tpu.matmul %1, %3, %cst {dimension_numbers = #tpu.dot_dimension_numbers<[1], [0], [0], [1], [0, 0, 1, 1], [], []>} : vector<16x32xbf16>, vector<32x384xbf16>, vector<16x384xf32> -> vector<16x384xf32>
    %c0_3 = arith.constant 0 : index
    %c0_4 = arith.constant 0 : index
    %5 = vector.load %arg3[%c0_3, %c0_4] : memref<1x384xf32, #tpu.memory_space<vmem>>, vector<1x384xf32>
    %6 = vector.broadcast %5 : vector<1x384xf32> to vector<16x384xf32>
    %7 = arith.addf %4, %6 : vector<16x384xf32>
    %c0_5 = arith.constant 0 : index
    %c0_6 = arith.constant 0 : index
    %8 = vector.load %arg4[%c0_5, %c0_6] : memref<16x384xf32, #tpu.memory_space<vmem>>, vector<16x384xf32>
    tpu.vector_store %arg4[%c0_5, %c0_6], %7 {strides = array<i32>} : memref<16x384xf32, #tpu.memory_space<vmem>>, vector<16x384xf32>,
    return
  }
  func.func @transform_0(%arg0: i32) -> (i32, i32) {
    %c0_i32 = arith.constant 0 : i32
    %c0_i32_0 = arith.constant 0 : i32
    return %arg0, %c0_i32 : i32, i32
  }
  func.func @transform_1(%arg0: i32) -> (i32, i32) {
    %c0_i32 = arith.constant 0 : i32
    %c0_i32_0 = arith.constant 0 : i32
    %c0_i32_1 = arith.constant 0 : i32
    return %c0_i32, %c0_i32_0 : i32, i32
  }
  func.func @transform_2(%arg0: i32) -> (i32, i32) {
    %c0_i32 = arith.constant 0 : i32
    %c0_i32_0 = arith.constant 0 : i32
    %c0_i32_1 = arith.constant 0 : i32
    return %c0_i32, %c0_i32_0 : i32, i32
  }
  func.func @transform_3(%arg0: i32) -> (i32, i32) {
    %c0_i32 = arith.constant 0 : i32
    %c0_i32_0 = arith.constant 0 : i32
    return %arg0, %c0_i32 : i32, i32
  }
}

module attributes {stable_mosaic.version = 11 : i64} {
  func.func @_linear_kernel(%arg0: i32, %arg1: memref<128x8xf32, #tpu.memory_space<vmem>>, %arg2: memref<8x4xf32, #tpu.memory_space<vmem>>, %arg3: memref<1x4xf32, #tpu.memory_space<vmem>>, %arg4: memref<128x4xf32, #tpu.memory_space<vmem>>) attributes {dimension_semantics = [#tpu.dimension_semantics<parallel>], iteration_bounds = array<i64: 2>, scalar_prefetch = 0 : i64, scratch_operands = 0 : i64, tpu.core_type = #tpu.core_type<tc>, window_params = [{transform_indices = @transform_0, window_bounds = array<i64: 128, 8>}, {pipeline_mode = #tpu.pipeline_mode<synchronous>, transform_indices = @transform_1, window_bounds = array<i64: 8, 4>}, {pipeline_mode = #tpu.pipeline_mode<synchronous>, transform_indices = @transform_2, window_bounds = array<i64: 1, 4>}, {transform_indices = @transform_3, window_bounds = array<i64: 128, 4>}]} {
    %c0 = arith.constant 0 : index
    %c0_0 = arith.constant 0 : index
    %0 = vector.load %arg1[%c0, %c0_0] : memref<128x8xf32, #tpu.memory_space<vmem>>, vector<128x8xf32>
    %1 = arith.truncf %0 : vector<128x8xf32> to vector<128x8xbf16>
    %c0_1 = arith.constant 0 : index
    %c0_2 = arith.constant 0 : index
    %2 = vector.load %arg2[%c0_1, %c0_2] : memref<8x4xf32, #tpu.memory_space<vmem>>, vector<8x4xf32>
    %3 = arith.truncf %2 : vector<8x4xf32> to vector<8x4xbf16>
    %cst = arith.constant dense<0.000000e+00> : vector<128x4xf32>
    %4 = tpu.matmul %1, %3, %cst {dimension_numbers = #tpu.dot_dimension_numbers<[1], [0], [0], [1], [0, 0, 1, 1], [], []>} : vector<128x8xbf16>, vector<8x4xbf16>, vector<128x4xf32> -> vector<128x4xf32>
    %c0_3 = arith.constant 0 : index
    %c0_4 = arith.constant 0 : index
    %5 = vector.load %arg3[%c0_3, %c0_4] : memref<1x4xf32, #tpu.memory_space<vmem>>, vector<1x4xf32>
    %6 = vector.broadcast %5 : vector<1x4xf32> to vector<128x4xf32>
    %7 = arith.addf %4, %6 : vector<128x4xf32>
    %c0_5 = arith.constant 0 : index
    %c0_6 = arith.constant 0 : index
    %8 = vector.load %arg4[%c0_5, %c0_6] : memref<128x4xf32, #tpu.memory_space<vmem>>, vector<128x4xf32>
    tpu.vector_store %arg4[%c0_5, %c0_6], %7 {strides = array<i32>} : memref<128x4xf32, #tpu.memory_space<vmem>>, vector<128x4xf32>,
    return
  }
  func.func @transform_0(%arg0: i32) -> (i32, i32) {
    %c0_i32 = arith.constant 0 : i32
    %c0_i32_0 = arith.constant 0 : i32
    return %arg0, %c0_i32 : i32, i32
  }
  func.func @transform_1(%arg0: i32) -> (i32, i32) {
    %c0_i32 = arith.constant 0 : i32
    %c0_i32_0 = arith.constant 0 : i32
    %c0_i32_1 = arith.constant 0 : i32
    return %c0_i32, %c0_i32_0 : i32, i32
  }
  func.func @transform_2(%arg0: i32) -> (i32, i32) {
    %c0_i32 = arith.constant 0 : i32
    %c0_i32_0 = arith.constant 0 : i32
    %c0_i32_1 = arith.constant 0 : i32
    return %c0_i32, %c0_i32_0 : i32, i32
  }
  func.func @transform_3(%arg0: i32) -> (i32, i32) {
    %c0_i32 = arith.constant 0 : i32
    %c0_i32_0 = arith.constant 0 : i32
    return %arg0, %c0_i32 : i32, i32
  }
}

module attributes {stable_mosaic.version = 11 : i64} {
  func.func @_ipa_attention_kernel(%arg0: i32, %arg1: memref<4xf32, #tpu.memory_space<smem>>, %arg2: memref<16x192xf32, #tpu.memory_space<vmem>>, %arg3: memref<4x16x12xf32, #tpu.memory_space<vmem>>, %arg4: memref<4x16x12xf32, #tpu.memory_space<vmem>>, %arg5: memref<4x16x24xf32, #tpu.memory_space<vmem>>, %arg6: memref<4x16x16xf32, #tpu.memory_space<vmem>>, %arg7: memref<16x8x16xf32, #tpu.memory_space<vmem>>, %arg8: memref<16x192xf32, #tpu.memory_space<vmem>>) attributes {dimension_semantics = [#tpu.dimension_semantics<arbitrary>], iteration_bounds = array<i64: 1>, scalar_prefetch = 1 : i64, scratch_operands = 0 : i64, tpu.core_type = #tpu.core_type<tc>, window_params = [{pipeline_mode = #tpu.pipeline_mode<synchronous>, transform_indices = @transform_0, window_bounds = array<i64: 16, 192>}, {pipeline_mode = #tpu.pipeline_mode<synchronous>, transform_indices = @transform_1, window_bounds = array<i64: 4, 16, 12>}, {pipeline_mode = #tpu.pipeline_mode<synchronous>, transform_indices = @transform_2, window_bounds = array<i64: 4, 16, 12>}, {pipeline_mode = #tpu.pipeline_mode<synchronous>, transform_indices = @transform_3, window_bounds = array<i64: 4, 16, 24>}, {pipeline_mode = #tpu.pipeline_mode<synchronous>, transform_indices = @transform_4, window_bounds = array<i64: 4, 16, 16>}, {pipeline_mode = #tpu.pipeline_mode<synchronous>, transform_indices = @transform_5, window_bounds = array<i64: 16, 8, 16>}, {pipeline_mode = #tpu.pipeline_mode<synchronous>, transform_indices = @transform_6, window_bounds = array<i64: 16, 192>}]} {
    %c0 = arith.constant 0 : index
    %c0_0 = arith.constant 0 : index
    %0 = vector.load %arg2[%c0, %c0_0] : memref<16x192xf32, #tpu.memory_space<vmem>>, vector<16x192xf32>
    %c0_1 = arith.constant 0 : index
    %c0_2 = arith.constant 0 : index
    %c0_3 = arith.constant 0 : index
    %1 = vector.load %arg3[%c0_1, %c0_2, %c0_3] : memref<4x16x12xf32, #tpu.memory_space<vmem>>, vector<4x16x12xf32>
    %c0_4 = arith.constant 0 : index
    %c0_5 = arith.constant 0 : index
    %c0_6 = arith.constant 0 : index
    %2 = vector.load %arg4[%c0_4, %c0_5, %c0_6] : memref<4x16x12xf32, #tpu.memory_space<vmem>>, vector<4x16x12xf32>
    %c0_7 = arith.constant 0 : index
    %c0_8 = arith.constant 0 : index
    %c0_9 = arith.constant 0 : index
    %3 = vector.load %arg5[%c0_7, %c0_8, %c0_9] : memref<4x16x24xf32, #tpu.memory_space<vmem>>, vector<4x16x24xf32>
    %c0_10 = arith.constant 0 : index
    %c0_11 = arith.constant 0 : index
    %c0_12 = arith.constant 0 : index
    %4 = vector.load %arg6[%c0_10, %c0_11, %c0_12] : memref<4x16x16xf32, #tpu.memory_space<vmem>>, vector<4x16x16xf32>
    %c0_13 = arith.constant 0 : index
    %c0_14 = arith.constant 0 : index
    %c0_15 = arith.constant 0 : index
    %5 = vector.load %arg7[%c0_13, %c0_14, %c0_15] : memref<16x8x16xf32, #tpu.memory_space<vmem>>, vector<16x8x16xf32>
    %cst = arith.constant 1.000000e+00 : f32
    %6 = vector.broadcast %cst : f32 to vector<16x1xf32>
    %c0_16 = arith.constant 0 : index
    %7 = memref.load %arg1[%c0_16] : memref<4xf32, #tpu.memory_space<smem>>
    %cst_17 = arith.constant 0.235702261 : f32
    %8 = arith.mulf %7, %cst_17 : f32
    %9 = vector.extract_strided_slice %0 {offsets = [0, 0], sizes = [16, 16], strides = [1, 1]} : vector<16x192xf32> to vector<16x16xf32>
    %cst_18 = arith.constant 2.500000e-01 : f32
    %10 = vector.broadcast %cst_18 : f32 to vector<16x16xf32>
    %11 = arith.mulf %9, %10 : vector<16x16xf32>
    %12 = vector.extract_strided_slice %0 {offsets = [0, 64], sizes = [16, 16], strides = [1, 1]} : vector<16x192xf32> to vector<16x16xf32>
    %13 = vector.extract_strided_slice %0 {offsets = [0, 128], sizes = [16, 16], strides = [1, 1]} : vector<16x192xf32> to vector<16x16xf32>
    %14 = vector.extract_strided_slice %1 {offsets = [0, 0, 0], sizes = [1, 16, 12], strides = [1, 1, 1]} : vector<4x16x12xf32> to vector<1x16x12xf32>
    %15 = vector.shape_cast %14 : vector<1x16x12xf32> to vector<16x12xf32>
    %16 = vector.extract_strided_slice %2 {offsets = [0, 0, 0], sizes = [1, 16, 12], strides = [1, 1, 1]} : vector<4x16x12xf32> to vector<1x16x12xf32>
    %17 = vector.shape_cast %16 : vector<1x16x12xf32> to vector<16x12xf32>
    %18 = vector.extract_strided_slice %3 {offsets = [0, 0, 0], sizes = [1, 16, 24], strides = [1, 1, 1]} : vector<4x16x24xf32> to vector<1x16x24xf32>
    %19 = vector.shape_cast %18 : vector<1x16x24xf32> to vector<16x24xf32>
    %20 = arith.mulf %15, %15 : vector<16x12xf32>
    %cst_19 = arith.constant dense<0.000000e+00> : vector<16xf32>
    %21 = vector.multi_reduction <add>, %20, %cst_19 [1] : vector<16x12xf32> to vector<16xf32>
    %22 = vector.shape_cast %21 : vector<16xf32> to vector<16x1xf32>
    %23 = arith.mulf %17, %17 : vector<16x12xf32>
    %cst_20 = arith.constant dense<0.000000e+00> : vector<16xf32>
    %24 = vector.multi_reduction <add>, %23, %cst_20 [1] : vector<16x12xf32> to vector<16xf32>
    %25 = vector.shape_cast %24 : vector<16xf32> to vector<16x1xf32>
    %26 = vector.broadcast %8 : f32 to vector<16x12xf32>
    %27 = arith.mulf %26, %15 : vector<16x12xf32>
    %28 = tpu.concatenate %11, %27, %6 in 1 : vector<16x16xf32>, vector<16x12xf32>, vector<16x1xf32> -> vector<16x29xf32>
    %cst_21 = arith.constant -5.000000e-01 : f32
    %29 = arith.mulf %cst_21, %8 : f32
    %30 = vector.broadcast %29 : f32 to vector<16x1xf32>
    %31 = arith.mulf %30, %25 : vector<16x1xf32>
    %32 = tpu.concatenate %12, %17, %31 in 1 : vector<16x16xf32>, vector<16x12xf32>, vector<16x1xf32> -> vector<16x29xf32>
    %33 = arith.truncf %28 : vector<16x29xf32> to vector<16x29xbf16>
    %34 = arith.truncf %32 : vector<16x29xf32> to vector<16x29xbf16>
    %cst_22 = arith.constant dense<0.000000e+00> : vector<16x16xf32>
    %35 = tpu.matmul %33, %34, %cst_22 {dimension_numbers = #tpu.dot_dimension_numbers<[1], [1], [0], [0], [0, 0, 1, 0], [], []>} : vector<16x29xbf16>, vector<16x29xbf16>, vector<16x16xf32> -> vector<16x16xf32>
    %36 = vector.extract_strided_slice %4 {offsets = [0, 0, 0], sizes = [1, 16, 16], strides = [1, 1, 1]} : vector<4x16x16xf32> to vector<1x16x16xf32>
    %37 = vector.shape_cast %36 : vector<1x16x16xf32> to vector<16x16xf32>
    %38 = arith.addf %35, %37 : vector<16x16xf32>
    %cst_23 = arith.constant 5.000000e-01 : f32
    %39 = arith.mulf %cst_23, %8 : f32
    %40 = vector.broadcast %39 : f32 to vector<16x1xf32>
    %41 = arith.mulf %40, %22 : vector<16x1xf32>
    %42 = vector.broadcast %41 : vector<16x1xf32> to vector<16x16xf32>
    %43 = arith.subf %38, %42 : vector<16x16xf32>
    %cst_24 = arith.constant 0.577350259 : f32
    %44 = vector.broadcast %cst_24 : f32 to vector<16x16xf32>
    %45 = arith.mulf %44, %43 : vector<16x16xf32>
    %cst_25 = arith.constant dense<0xFF800000> : vector<16xf32>
    %46 = vector.multi_reduction <maximumf>, %45, %cst_25 [1] : vector<16x16xf32> to vector<16xf32>
    %47 = vector.shape_cast %46 : vector<16xf32> to vector<16x1xf32>
    %48 = vector.broadcast %47 : vector<16x1xf32> to vector<16x16xf32>
    %49 = arith.subf %45, %48 : vector<16x16xf32>
    %50 = math.exp %49 : vector<16x16xf32>
    %cst_26 = arith.constant dense<0.000000e+00> : vector<16xf32>
    %51 = vector.multi_reduction <add>, %50, %cst_26 [1] : vector<16x16xf32> to vector<16xf32>
    %52 = vector.shape_cast %51 : vector<16xf32> to vector<16x1xf32>
    %53 = tpu.reciprocal %52 {approx = true} : vector<16x1xf32> -> vector<16x1xf32>
    %54 = vector.broadcast %53 : vector<16x1xf32> to vector<16x16xf32>
    %55 = arith.mulf %50, %54 : vector<16x16xf32>
    %56 = tpu.concatenate %13, %19 in 1 : vector<16x16xf32>, vector<16x24xf32> -> vector<16x40xf32>
    %57 = arith.truncf %55 : vector<16x16xf32> to vector<16x16xbf16>
    %58 = arith.truncf %56 : vector<16x40xf32> to vector<16x40xbf16>
    %cst_27 = arith.constant dense<0.000000e+00> : vector<16x40xf32>
    %59 = tpu.matmul %57, %58, %cst_27 {dimension_numbers = #tpu.dot_dimension_numbers<[1], [0], [0], [1], [0, 0, 1, 1], [], []>} : vector<16x16xbf16>, vector<16x40xbf16>, vector<16x40xf32> -> vector<16x40xf32>
    %60 = vector.shape_cast %55 : vector<16x16xf32> to vector<16x1x16xf32>
    %61 = vector.broadcast %60 : vector<16x1x16xf32> to vector<16x8x16xf32>
    %62 = arith.mulf %61, %5 : vector<16x8x16xf32>
    %cst_28 = arith.constant dense<0.000000e+00> : vector<16x8xf32>
    %63 = vector.multi_reduction <add>, %62, %cst_28 [2] : vector<16x8x16xf32> to vector<16x8xf32>
    %64 = vector.extract_strided_slice %59 {offsets = [0, 0], sizes = [16, 16], strides = [1, 1]} : vector<16x40xf32> to vector<16x16xf32>
    %65 = vector.extract_strided_slice %59 {offsets = [0, 16], sizes = [16, 24], strides = [1, 1]} : vector<16x40xf32> to vector<16x24xf32>
    %c1 = arith.constant 1 : index
    %66 = memref.load %arg1[%c1] : memref<4xf32, #tpu.memory_space<smem>>
    %cst_29 = arith.constant 0.235702261 : f32
    %67 = arith.mulf %66, %cst_29 : f32
    %68 = vector.extract_strided_slice %0 {offsets = [0, 16], sizes = [16, 16], strides = [1, 1]} : vector<16x192xf32> to vector<16x16xf32>
    %cst_30 = arith.constant 2.500000e-01 : f32
    %69 = vector.broadcast %cst_30 : f32 to vector<16x16xf32>
    %70 = arith.mulf %68, %69 : vector<16x16xf32>
    %71 = vector.extract_strided_slice %0 {offsets = [0, 80], sizes = [16, 16], strides = [1, 1]} : vector<16x192xf32> to vector<16x16xf32>
    %72 = vector.extract_strided_slice %0 {offsets = [0, 144], sizes = [16, 16], strides = [1, 1]} : vector<16x192xf32> to vector<16x16xf32>
    %73 = vector.extract_strided_slice %1 {offsets = [1, 0, 0], sizes = [1, 16, 12], strides = [1, 1, 1]} : vector<4x16x12xf32> to vector<1x16x12xf32>
    %74 = vector.shape_cast %73 : vector<1x16x12xf32> to vector<16x12xf32>
    %75 = vector.extract_strided_slice %2 {offsets = [1, 0, 0], sizes = [1, 16, 12], strides = [1, 1, 1]} : vector<4x16x12xf32> to vector<1x16x12xf32>
    %76 = vector.shape_cast %75 : vector<1x16x12xf32> to vector<16x12xf32>
    %77 = vector.extract_strided_slice %3 {offsets = [1, 0, 0], sizes = [1, 16, 24], strides = [1, 1, 1]} : vector<4x16x24xf32> to vector<1x16x24xf32>
    %78 = vector.shape_cast %77 : vector<1x16x24xf32> to vector<16x24xf32>
    %79 = arith.mulf %74, %74 : vector<16x12xf32>
    %cst_31 = arith.constant dense<0.000000e+00> : vector<16xf32>
    %80 = vector.multi_reduction <add>, %79, %cst_31 [1] : vector<16x12xf32> to vector<16xf32>
    %81 = vector.shape_cast %80 : vector<16xf32> to vector<16x1xf32>
    %82 = arith.mulf %76, %76 : vector<16x12xf32>
    %cst_32 = arith.constant dense<0.000000e+00> : vector<16xf32>
    %83 = vector.multi_reduction <add>, %82, %cst_32 [1] : vector<16x12xf32> to vector<16xf32>
    %84 = vector.shape_cast %83 : vector<16xf32> to vector<16x1xf32>
    %85 = vector.broadcast %67 : f32 to vector<16x12xf32>
    %86 = arith.mulf %85, %74 : vector<16x12xf32>
    %87 = tpu.concatenate %70, %86, %6 in 1 : vector<16x16xf32>, vector<16x12xf32>, vector<16x1xf32> -> vector<16x29xf32>
    %cst_33 = arith.constant -5.000000e-01 : f32
    %88 = arith.mulf %cst_33, %67 : f32
    %89 = vector.broadcast %88 : f32 to vector<16x1xf32>
    %90 = arith.mulf %89, %84 : vector<16x1xf32>
    %91 = tpu.concatenate %71, %76, %90 in 1 : vector<16x16xf32>, vector<16x12xf32>, vector<16x1xf32> -> vector<16x29xf32>
    %92 = arith.truncf %87 : vector<16x29xf32> to vector<16x29xbf16>
    %93 = arith.truncf %91 : vector<16x29xf32> to vector<16x29xbf16>
    %cst_34 = arith.constant dense<0.000000e+00> : vector<16x16xf32>
    %94 = tpu.matmul %92, %93, %cst_34 {dimension_numbers = #tpu.dot_dimension_numbers<[1], [1], [0], [0], [0, 0, 1, 0], [], []>} : vector<16x29xbf16>, vector<16x29xbf16>, vector<16x16xf32> -> vector<16x16xf32>
    %95 = vector.extract_strided_slice %4 {offsets = [1, 0, 0], sizes = [1, 16, 16], strides = [1, 1, 1]} : vector<4x16x16xf32> to vector<1x16x16xf32>
    %96 = vector.shape_cast %95 : vector<1x16x16xf32> to vector<16x16xf32>
    %97 = arith.addf %94, %96 : vector<16x16xf32>
    %cst_35 = arith.constant 5.000000e-01 : f32
    %98 = arith.mulf %cst_35, %67 : f32
    %99 = vector.broadcast %98 : f32 to vector<16x1xf32>
    %100 = arith.mulf %99, %81 : vector<16x1xf32>
    %101 = vector.broadcast %100 : vector<16x1xf32> to vector<16x16xf32>
    %102 = arith.subf %97, %101 : vector<16x16xf32>
    %cst_36 = arith.constant 0.577350259 : f32
    %103 = vector.broadcast %cst_36 : f32 to vector<16x16xf32>
    %104 = arith.mulf %103, %102 : vector<16x16xf32>
    %cst_37 = arith.constant dense<0xFF800000> : vector<16xf32>
    %105 = vector.multi_reduction <maximumf>, %104, %cst_37 [1] : vector<16x16xf32> to vector<16xf32>
    %106 = vector.shape_cast %105 : vector<16xf32> to vector<16x1xf32>
    %107 = vector.broadcast %106 : vector<16x1xf32> to vector<16x16xf32>
    %108 = arith.subf %104, %107 : vector<16x16xf32>
    %109 = math.exp %108 : vector<16x16xf32>
    %cst_38 = arith.constant dense<0.000000e+00> : vector<16xf32>
    %110 = vector.multi_reduction <add>, %109, %cst_38 [1] : vector<16x16xf32> to vector<16xf32>
    %111 = vector.shape_cast %110 : vector<16xf32> to vector<16x1xf32>
    %112 = tpu.reciprocal %111 {approx = true} : vector<16x1xf32> -> vector<16x1xf32>
    %113 = vector.broadcast %112 : vector<16x1xf32> to vector<16x16xf32>
    %114 = arith.mulf %109, %113 : vector<16x16xf32>
    %115 = tpu.concatenate %72, %78 in 1 : vector<16x16xf32>, vector<16x24xf32> -> vector<16x40xf32>
    %116 = arith.truncf %114 : vector<16x16xf32> to vector<16x16xbf16>
    %117 = arith.truncf %115 : vector<16x40xf32> to vector<16x40xbf16>
    %cst_39 = arith.constant dense<0.000000e+00> : vector<16x40xf32>
    %118 = tpu.matmul %116, %117, %cst_39 {dimension_numbers = #tpu.dot_dimension_numbers<[1], [0], [0], [1], [0, 0, 1, 1], [], []>} : vector<16x16xbf16>, vector<16x40xbf16>, vector<16x40xf32> -> vector<16x40xf32>
    %119 = vector.shape_cast %114 : vector<16x16xf32> to vector<16x1x16xf32>
    %120 = vector.broadcast %119 : vector<16x1x16xf32> to vector<16x8x16xf32>
    %121 = arith.mulf %120, %5 : vector<16x8x16xf32>
    %cst_40 = arith.constant dense<0.000000e+00> : vector<16x8xf32>
    %122 = vector.multi_reduction <add>, %121, %cst_40 [2] : vector<16x8x16xf32> to vector<16x8xf32>
    %123 = vector.extract_strided_slice %118 {offsets = [0, 0], sizes = [16, 16], strides = [1, 1]} : vector<16x40xf32> to vector<16x16xf32>
    %124 = vector.extract_strided_slice %118 {offsets = [0, 16], sizes = [16, 24], strides = [1, 1]} : vector<16x40xf32> to vector<16x24xf32>
    %c2 = arith.constant 2 : index
    %125 = memref.load %arg1[%c2] : memref<4xf32, #tpu.memory_space<smem>>
    %cst_41 = arith.constant 0.235702261 : f32
    %126 = arith.mulf %125, %cst_41 : f32
    %127 = vector.extract_strided_slice %0 {offsets = [0, 32], sizes = [16, 16], strides = [1, 1]} : vector<16x192xf32> to vector<16x16xf32>
    %cst_42 = arith.constant 2.500000e-01 : f32
    %128 = vector.broadcast %cst_42 : f32 to vector<16x16xf32>
    %129 = arith.mulf %127, %128 : vector<16x16xf32>
    %130 = vector.extract_strided_slice %0 {offsets = [0, 96], sizes = [16, 16], strides = [1, 1]} : vector<16x192xf32> to vector<16x16xf32>
    %131 = vector.extract_strided_slice %0 {offsets = [0, 160], sizes = [16, 16], strides = [1, 1]} : vector<16x192xf32> to vector<16x16xf32>
    %132 = vector.extract_strided_slice %1 {offsets = [2, 0, 0], sizes = [1, 16, 12], strides = [1, 1, 1]} : vector<4x16x12xf32> to vector<1x16x12xf32>
    %133 = vector.shape_cast %132 : vector<1x16x12xf32> to vector<16x12xf32>
    %134 = vector.extract_strided_slice %2 {offsets = [2, 0, 0], sizes = [1, 16, 12], strides = [1, 1, 1]} : vector<4x16x12xf32> to vector<1x16x12xf32>
    %135 = vector.shape_cast %134 : vector<1x16x12xf32> to vector<16x12xf32>
    %136 = vector.extract_strided_slice %3 {offsets = [2, 0, 0], sizes = [1, 16, 24], strides = [1, 1, 1]} : vector<4x16x24xf32> to vector<1x16x24xf32>
    %137 = vector.shape_cast %136 : vector<1x16x24xf32> to vector<16x24xf32>
    %138 = arith.mulf %133, %133 : vector<16x12xf32>
    %cst_43 = arith.constant dense<0.000000e+00> : vector<16xf32>
    %139 = vector.multi_reduction <add>, %138, %cst_43 [1] : vector<16x12xf32> to vector<16xf32>
    %140 = vector.shape_cast %139 : vector<16xf32> to vector<16x1xf32>
    %141 = arith.mulf %135, %135 : vector<16x12xf32>
    %cst_44 = arith.constant dense<0.000000e+00> : vector<16xf32>
    %142 = vector.multi_reduction <add>, %141, %cst_44 [1] : vector<16x12xf32> to vector<16xf32>
    %143 = vector.shape_cast %142 : vector<16xf32> to vector<16x1xf32>
    %144 = vector.broadcast %126 : f32 to vector<16x12xf32>
    %145 = arith.mulf %144, %133 : vector<16x12xf32>
    %146 = tpu.concatenate %129, %145, %6 in 1 : vector<16x16xf32>, vector<16x12xf32>, vector<16x1xf32> -> vector<16x29xf32>
    %cst_45 = arith.constant -5.000000e-01 : f32
    %147 = arith.mulf %cst_45, %126 : f32
    %148 = vector.broadcast %147 : f32 to vector<16x1xf32>
    %149 = arith.mulf %148, %143 : vector<16x1xf32>
    %150 = tpu.concatenate %130, %135, %149 in 1 : vector<16x16xf32>, vector<16x12xf32>, vector<16x1xf32> -> vector<16x29xf32>
    %151 = arith.truncf %146 : vector<16x29xf32> to vector<16x29xbf16>
    %152 = arith.truncf %150 : vector<16x29xf32> to vector<16x29xbf16>
    %cst_46 = arith.constant dense<0.000000e+00> : vector<16x16xf32>
    %153 = tpu.matmul %151, %152, %cst_46 {dimension_numbers = #tpu.dot_dimension_numbers<[1], [1], [0], [0], [0, 0, 1, 0], [], []>} : vector<16x29xbf16>, vector<16x29xbf16>, vector<16x16xf32> -> vector<16x16xf32>
    %154 = vector.extract_strided_slice %4 {offsets = [2, 0, 0], sizes = [1, 16, 16], strides = [1, 1, 1]} : vector<4x16x16xf32> to vector<1x16x16xf32>
    %155 = vector.shape_cast %154 : vector<1x16x16xf32> to vector<16x16xf32>
    %156 = arith.addf %153, %155 : vector<16x16xf32>
    %cst_47 = arith.constant 5.000000e-01 : f32
    %157 = arith.mulf %cst_47, %126 : f32
    %158 = vector.broadcast %157 : f32 to vector<16x1xf32>
    %159 = arith.mulf %158, %140 : vector<16x1xf32>
    %160 = vector.broadcast %159 : vector<16x1xf32> to vector<16x16xf32>
    %161 = arith.subf %156, %160 : vector<16x16xf32>
    %cst_48 = arith.constant 0.577350259 : f32
    %162 = vector.broadcast %cst_48 : f32 to vector<16x16xf32>
    %163 = arith.mulf %162, %161 : vector<16x16xf32>
    %cst_49 = arith.constant dense<0xFF800000> : vector<16xf32>
    %164 = vector.multi_reduction <maximumf>, %163, %cst_49 [1] : vector<16x16xf32> to vector<16xf32>
    %165 = vector.shape_cast %164 : vector<16xf32> to vector<16x1xf32>
    %166 = vector.broadcast %165 : vector<16x1xf32> to vector<16x16xf32>
    %167 = arith.subf %163, %166 : vector<16x16xf32>
    %168 = math.exp %167 : vector<16x16xf32>
    %cst_50 = arith.constant dense<0.000000e+00> : vector<16xf32>
    %169 = vector.multi_reduction <add>, %168, %cst_50 [1] : vector<16x16xf32> to vector<16xf32>
    %170 = vector.shape_cast %169 : vector<16xf32> to vector<16x1xf32>
    %171 = tpu.reciprocal %170 {approx = true} : vector<16x1xf32> -> vector<16x1xf32>
    %172 = vector.broadcast %171 : vector<16x1xf32> to vector<16x16xf32>
    %173 = arith.mulf %168, %172 : vector<16x16xf32>
    %174 = tpu.concatenate %131, %137 in 1 : vector<16x16xf32>, vector<16x24xf32> -> vector<16x40xf32>
    %175 = arith.truncf %173 : vector<16x16xf32> to vector<16x16xbf16>
    %176 = arith.truncf %174 : vector<16x40xf32> to vector<16x40xbf16>
    %cst_51 = arith.constant dense<0.000000e+00> : vector<16x40xf32>
    %177 = tpu.matmul %175, %176, %cst_51 {dimension_numbers = #tpu.dot_dimension_numbers<[1], [0], [0], [1], [0, 0, 1, 1], [], []>} : vector<16x16xbf16>, vector<16x40xbf16>, vector<16x40xf32> -> vector<16x40xf32>
    %178 = vector.shape_cast %173 : vector<16x16xf32> to vector<16x1x16xf32>
    %179 = vector.broadcast %178 : vector<16x1x16xf32> to vector<16x8x16xf32>
    %180 = arith.mulf %179, %5 : vector<16x8x16xf32>
    %cst_52 = arith.constant dense<0.000000e+00> : vector<16x8xf32>
    %181 = vector.multi_reduction <add>, %180, %cst_52 [2] : vector<16x8x16xf32> to vector<16x8xf32>
    %182 = vector.extract_strided_slice %177 {offsets = [0, 0], sizes = [16, 16], strides = [1, 1]} : vector<16x40xf32> to vector<16x16xf32>
    %183 = vector.extract_strided_slice %177 {offsets = [0, 16], sizes = [16, 24], strides = [1, 1]} : vector<16x40xf32> to vector<16x24xf32>
    %c3 = arith.constant 3 : index
    %184 = memref.load %arg1[%c3] : memref<4xf32, #tpu.memory_space<smem>>
    %cst_53 = arith.constant 0.235702261 : f32
    %185 = arith.mulf %184, %cst_53 : f32
    %186 = vector.extract_strided_slice %0 {offsets = [0, 48], sizes = [16, 16], strides = [1, 1]} : vector<16x192xf32> to vector<16x16xf32>
    %cst_54 = arith.constant 2.500000e-01 : f32
    %187 = vector.broadcast %cst_54 : f32 to vector<16x16xf32>
    %188 = arith.mulf %186, %187 : vector<16x16xf32>
    %189 = vector.extract_strided_slice %0 {offsets = [0, 112], sizes = [16, 16], strides = [1, 1]} : vector<16x192xf32> to vector<16x16xf32>
    %190 = vector.extract_strided_slice %0 {offsets = [0, 176], sizes = [16, 16], strides = [1, 1]} : vector<16x192xf32> to vector<16x16xf32>
    %191 = vector.extract_strided_slice %1 {offsets = [3, 0, 0], sizes = [1, 16, 12], strides = [1, 1, 1]} : vector<4x16x12xf32> to vector<1x16x12xf32>
    %192 = vector.shape_cast %191 : vector<1x16x12xf32> to vector<16x12xf32>
    %193 = vector.extract_strided_slice %2 {offsets = [3, 0, 0], sizes = [1, 16, 12], strides = [1, 1, 1]} : vector<4x16x12xf32> to vector<1x16x12xf32>
    %194 = vector.shape_cast %193 : vector<1x16x12xf32> to vector<16x12xf32>
    %195 = vector.extract_strided_slice %3 {offsets = [3, 0, 0], sizes = [1, 16, 24], strides = [1, 1, 1]} : vector<4x16x24xf32> to vector<1x16x24xf32>
    %196 = vector.shape_cast %195 : vector<1x16x24xf32> to vector<16x24xf32>
    %197 = arith.mulf %192, %192 : vector<16x12xf32>
    %cst_55 = arith.constant dense<0.000000e+00> : vector<16xf32>
    %198 = vector.multi_reduction <add>, %197, %cst_55 [1] : vector<16x12xf32> to vector<16xf32>
    %199 = vector.shape_cast %198 : vector<16xf32> to vector<16x1xf32>
    %200 = arith.mulf %194, %194 : vector<16x12xf32>
    %cst_56 = arith.constant dense<0.000000e+00> : vector<16xf32>
    %201 = vector.multi_reduction <add>, %200, %cst_56 [1] : vector<16x12xf32> to vector<16xf32>
    %202 = vector.shape_cast %201 : vector<16xf32> to vector<16x1xf32>
    %203 = vector.broadcast %185 : f32 to vector<16x12xf32>
    %204 = arith.mulf %203, %192 : vector<16x12xf32>
    %205 = tpu.concatenate %188, %204, %6 in 1 : vector<16x16xf32>, vector<16x12xf32>, vector<16x1xf32> -> vector<16x29xf32>
    %cst_57 = arith.constant -5.000000e-01 : f32
    %206 = arith.mulf %cst_57, %185 : f32
    %207 = vector.broadcast %206 : f32 to vector<16x1xf32>
    %208 = arith.mulf %207, %202 : vector<16x1xf32>
    %209 = tpu.concatenate %189, %194, %208 in 1 : vector<16x16xf32>, vector<16x12xf32>, vector<16x1xf32> -> vector<16x29xf32>
    %210 = arith.truncf %205 : vector<16x29xf32> to vector<16x29xbf16>
    %211 = arith.truncf %209 : vector<16x29xf32> to vector<16x29xbf16>
    %cst_58 = arith.constant dense<0.000000e+00> : vector<16x16xf32>
    %212 = tpu.matmul %210, %211, %cst_58 {dimension_numbers = #tpu.dot_dimension_numbers<[1], [1], [0], [0], [0, 0, 1, 0], [], []>} : vector<16x29xbf16>, vector<16x29xbf16>, vector<16x16xf32> -> vector<16x16xf32>
    %213 = vector.extract_strided_slice %4 {offsets = [3, 0, 0], sizes = [1, 16, 16], strides = [1, 1, 1]} : vector<4x16x16xf32> to vector<1x16x16xf32>
    %214 = vector.shape_cast %213 : vector<1x16x16xf32> to vector<16x16xf32>
    %215 = arith.addf %212, %214 : vector<16x16xf32>
    %cst_59 = arith.constant 5.000000e-01 : f32
    %216 = arith.mulf %cst_59, %185 : f32
    %217 = vector.broadcast %216 : f32 to vector<16x1xf32>
    %218 = arith.mulf %217, %199 : vector<16x1xf32>
    %219 = vector.broadcast %218 : vector<16x1xf32> to vector<16x16xf32>
    %220 = arith.subf %215, %219 : vector<16x16xf32>
    %cst_60 = arith.constant 0.577350259 : f32
    %221 = vector.broadcast %cst_60 : f32 to vector<16x16xf32>
    %222 = arith.mulf %221, %220 : vector<16x16xf32>
    %cst_61 = arith.constant dense<0xFF800000> : vector<16xf32>
    %223 = vector.multi_reduction <maximumf>, %222, %cst_61 [1] : vector<16x16xf32> to vector<16xf32>
    %224 = vector.shape_cast %223 : vector<16xf32> to vector<16x1xf32>
    %225 = vector.broadcast %224 : vector<16x1xf32> to vector<16x16xf32>
    %226 = arith.subf %222, %225 : vector<16x16xf32>
    %227 = math.exp %226 : vector<16x16xf32>
    %cst_62 = arith.constant dense<0.000000e+00> : vector<16xf32>
    %228 = vector.multi_reduction <add>, %227, %cst_62 [1] : vector<16x16xf32> to vector<16xf32>
    %229 = vector.shape_cast %228 : vector<16xf32> to vector<16x1xf32>
    %230 = tpu.reciprocal %229 {approx = true} : vector<16x1xf32> -> vector<16x1xf32>
    %231 = vector.broadcast %230 : vector<16x1xf32> to vector<16x16xf32>
    %232 = arith.mulf %227, %231 : vector<16x16xf32>
    %233 = tpu.concatenate %190, %196 in 1 : vector<16x16xf32>, vector<16x24xf32> -> vector<16x40xf32>
    %234 = arith.truncf %232 : vector<16x16xf32> to vector<16x16xbf16>
    %235 = arith.truncf %233 : vector<16x40xf32> to vector<16x40xbf16>
    %cst_63 = arith.constant dense<0.000000e+00> : vector<16x40xf32>
    %236 = tpu.matmul %234, %235, %cst_63 {dimension_numbers = #tpu.dot_dimension_numbers<[1], [0], [0], [1], [0, 0, 1, 1], [], []>} : vector<16x16xbf16>, vector<16x40xbf16>, vector<16x40xf32> -> vector<16x40xf32>
    %237 = vector.shape_cast %232 : vector<16x16xf32> to vector<16x1x16xf32>
    %238 = vector.broadcast %237 : vector<16x1x16xf32> to vector<16x8x16xf32>
    %239 = arith.mulf %238, %5 : vector<16x8x16xf32>
    %cst_64 = arith.constant dense<0.000000e+00> : vector<16x8xf32>
    %240 = vector.multi_reduction <add>, %239, %cst_64 [2] : vector<16x8x16xf32> to vector<16x8xf32>
    %241 = vector.extract_strided_slice %236 {offsets = [0, 0], sizes = [16, 16], strides = [1, 1]} : vector<16x40xf32> to vector<16x16xf32>
    %242 = vector.extract_strided_slice %236 {offsets = [0, 16], sizes = [16, 24], strides = [1, 1]} : vector<16x40xf32> to vector<16x24xf32>
    %243 = tpu.concatenate %64, %123, %182, %241, %65, %124, %183, %242, %63, %122, %181, %240 in 1 : vector<16x16xf32>, vector<16x16xf32>, vector<16x16xf32>, vector<16x16xf32>, vector<16x24xf32>, vector<16x24xf32>, vector<16x24xf32>, vector<16x24xf32>, vector<16x8xf32>, vector<16x8xf32>, vector<16x8xf32>, vector<16x8xf32> -> vector<16x192xf32>
    %c0_65 = arith.constant 0 : index
    %c0_66 = arith.constant 0 : index
    %244 = vector.load %arg8[%c0_65, %c0_66] : memref<16x192xf32, #tpu.memory_space<vmem>>, vector<16x192xf32>
    tpu.vector_store %arg8[%c0_65, %c0_66], %243 {strides = array<i32>} : memref<16x192xf32, #tpu.memory_space<vmem>>, vector<16x192xf32>,
    return
  }
  func.func @transform_0(%arg0: i32, %arg1: memref<4xf32, #tpu.memory_space<smem>>) -> (i32, i32) {
    %c0_i32 = arith.constant 0 : i32
    %c0_i32_0 = arith.constant 0 : i32
    %c0_i32_1 = arith.constant 0 : i32
    return %c0_i32, %c0_i32_0 : i32, i32
  }
  func.func @transform_1(%arg0: i32, %arg1: memref<4xf32, #tpu.memory_space<smem>>) -> (i32, i32, i32) {
    %c0_i32 = arith.constant 0 : i32
    %c0_i32_0 = arith.constant 0 : i32
    %c0_i32_1 = arith.constant 0 : i32
    %c0_i32_2 = arith.constant 0 : i32
    return %c0_i32, %c0_i32_0, %c0_i32_1 : i32, i32, i32
  }
  func.func @transform_2(%arg0: i32, %arg1: memref<4xf32, #tpu.memory_space<smem>>) -> (i32, i32, i32) {
    %c0_i32 = arith.constant 0 : i32
    %c0_i32_0 = arith.constant 0 : i32
    %c0_i32_1 = arith.constant 0 : i32
    %c0_i32_2 = arith.constant 0 : i32
    return %c0_i32, %c0_i32_0, %c0_i32_1 : i32, i32, i32
  }
  func.func @transform_3(%arg0: i32, %arg1: memref<4xf32, #tpu.memory_space<smem>>) -> (i32, i32, i32) {
    %c0_i32 = arith.constant 0 : i32
    %c0_i32_0 = arith.constant 0 : i32
    %c0_i32_1 = arith.constant 0 : i32
    %c0_i32_2 = arith.constant 0 : i32
    return %c0_i32, %c0_i32_0, %c0_i32_1 : i32, i32, i32
  }
  func.func @transform_4(%arg0: i32, %arg1: memref<4xf32, #tpu.memory_space<smem>>) -> (i32, i32, i32) {
    %c0_i32 = arith.constant 0 : i32
    %c0_i32_0 = arith.constant 0 : i32
    %c0_i32_1 = arith.constant 0 : i32
    %c0_i32_2 = arith.constant 0 : i32
    return %c0_i32, %c0_i32_0, %c0_i32_1 : i32, i32, i32
  }
  func.func @transform_5(%arg0: i32, %arg1: memref<4xf32, #tpu.memory_space<smem>>) -> (i32, i32, i32) {
    %c0_i32 = arith.constant 0 : i32
    %c0_i32_0 = arith.constant 0 : i32
    %c0_i32_1 = arith.constant 0 : i32
    %c0_i32_2 = arith.constant 0 : i32
    return %c0_i32, %c0_i32_0, %c0_i32_1 : i32, i32, i32
  }
  func.func @transform_6(%arg0: i32, %arg1: memref<4xf32, #tpu.memory_space<smem>>) -> (i32, i32) {
    %c0_i32 = arith.constant 0 : i32
    %c0_i32_0 = arith.constant 0 : i32
    %c0_i32_1 = arith.constant 0 : i32
    return %c0_i32, %c0_i32_0 : i32, i32
  }
}

module attributes {stable_mosaic.version = 11 : i64} {
  func.func @_linear_kernel(%arg0: i32, %arg1: memref<16x224xf32, #tpu.memory_space<vmem>>, %arg2: memref<224x32xf32, #tpu.memory_space<vmem>>, %arg3: memref<1x32xf32, #tpu.memory_space<vmem>>, %arg4: memref<16x32xf32, #tpu.memory_space<vmem>>) attributes {dimension_semantics = [#tpu.dimension_semantics<parallel>], iteration_bounds = array<i64: 1>, scalar_prefetch = 0 : i64, scratch_operands = 0 : i64, tpu.core_type = #tpu.core_type<tc>, window_params = [{transform_indices = @transform_0, window_bounds = array<i64: 16, 224>}, {pipeline_mode = #tpu.pipeline_mode<synchronous>, transform_indices = @transform_1, window_bounds = array<i64: 224, 32>}, {pipeline_mode = #tpu.pipeline_mode<synchronous>, transform_indices = @transform_2, window_bounds = array<i64: 1, 32>}, {transform_indices = @transform_3, window_bounds = array<i64: 16, 32>}]} {
    %c0 = arith.constant 0 : index
    %c0_0 = arith.constant 0 : index
    %0 = vector.load %arg1[%c0, %c0_0] : memref<16x224xf32, #tpu.memory_space<vmem>>, vector<16x224xf32>
    %1 = arith.truncf %0 : vector<16x224xf32> to vector<16x224xbf16>
    %c0_1 = arith.constant 0 : index
    %c0_2 = arith.constant 0 : index
    %2 = vector.load %arg2[%c0_1, %c0_2] : memref<224x32xf32, #tpu.memory_space<vmem>>, vector<224x32xf32>
    %3 = arith.truncf %2 : vector<224x32xf32> to vector<224x32xbf16>
    %cst = arith.constant dense<0.000000e+00> : vector<16x32xf32>
    %4 = tpu.matmul %1, %3, %cst {dimension_numbers = #tpu.dot_dimension_numbers<[1], [0], [0], [1], [0, 0, 1, 1], [], []>} : vector<16x224xbf16>, vector<224x32xbf16>, vector<16x32xf32> -> vector<16x32xf32>
    %c0_3 = arith.constant 0 : index
    %c0_4 = arith.constant 0 : index
    %5 = vector.load %arg3[%c0_3, %c0_4] : memref<1x32xf32, #tpu.memory_space<vmem>>, vector<1x32xf32>
    %6 = vector.broadcast %5 : vector<1x32xf32> to vector<16x32xf32>
    %7 = arith.addf %4, %6 : vector<16x32xf32>
    %c0_5 = arith.constant 0 : index
    %c0_6 = arith.constant 0 : index
    %8 = vector.load %arg4[%c0_5, %c0_6] : memref<16x32xf32, #tpu.memory_space<vmem>>, vector<16x32xf32>
    tpu.vector_store %arg4[%c0_5, %c0_6], %7 {strides = array<i32>} : memref<16x32xf32, #tpu.memory_space<vmem>>, vector<16x32xf32>,
    return
  }
  func.func @transform_0(%arg0: i32) -> (i32, i32) {
    %c0_i32 = arith.constant 0 : i32
    %c0_i32_0 = arith.constant 0 : i32
    return %arg0, %c0_i32 : i32, i32
  }
  func.func @transform_1(%arg0: i32) -> (i32, i32) {
    %c0_i32 = arith.constant 0 : i32
    %c0_i32_0 = arith.constant 0 : i32
    %c0_i32_1 = arith.constant 0 : i32
    return %c0_i32, %c0_i32_0 : i32, i32
  }
  func.func @transform_2(%arg0: i32) -> (i32, i32) {
    %c0_i32 = arith.constant 0 : i32
    %c0_i32_0 = arith.constant 0 : i32
    %c0_i32_1 = arith.constant 0 : i32
    return %c0_i32, %c0_i32_0 : i32, i32
  }
  func.func @transform_3(%arg0: i32) -> (i32, i32) {
    %c0_i32 = arith.constant 0 : i32
    %c0_i32_0 = arith.constant 0 : i32
    return %arg0, %c0_i32 : i32, i32
  }
}

</mosaic_0001>

<bundles_post_ra>
// kernel: ipa_forward.4
= control target key start
LH: loop header
LB: loop body
LE: loop exit
PB: predicated region body
PF: predicated region fallthrough
CT: control target
= control target key end

     0   :  { %v167_v0 = vmov 0.0   ;;  %vm168_vm0 = vmmov 0   ;;  %v169_v8 = vmov 0   ;;  %vm53_vm1 = vcmask 261120   ;;  %s253_s1 = inlined_call_operand.vmem [shape: f32[32,384], index: 1, kind: input, shape index: {}]   ;;  %s254_s0 = inlined_call_operand.vmem [shape: f32[16,32], index: 0, kind: input, shape index: {}]   ;;  %s255_s2 = inlined_call_operand.vmem [shape: f32[1,384], index: 2, kind: input, shape index: {}]   ;;  %s256_s3 = inlined_call_operand.vmem [shape: f32[16,384], index: 3, kind: output, shape index: {}]  }
   0x1   :  { %156 = vmatprep.subr.bf16.mxu1 %v167_v0  ;;  %v19_v1 = vld [vmem:[%s253_s1 + $0x8] sm:$0xff]  ;;  %v22_v2 = vld [vmem:[%s253_s1 + $0x20] sm:$0xff]  ;;  %v20_v3 = vld [vmem:[%s253_s1 + $0x10] sm:$0xff]  ;;  %160 = vmatprep.mubr.msk.bf16.mxu1 %vm168_vm0, %v167_v0  ;;  %v38_v23 = vlaneseq }
   0x2   :  { %v31_v4 = vpack.c.bf16 %v22_v2, %v19_v1  ;;  %v23_v5 = vld [vmem:[%s253_s1 + $0x28] sm:$0xff]  ;;  %v18_v6 = vld [vmem:[%s253_s1] sm:$0xff]  ;;  %v21_v7 = vld [vmem:[%s253_s1 + $0x18] sm:$0xff]  ;;  %89 = vmatprep.mubr.bf16.mxu0 %v169_v8 }
   0x3   :  { %v32_v9 = vpack.c.bf16 %v23_v5, %v20_v3  ;;  %v30_v10 = vpack.c.bf16 %v21_v7, %v18_v6  ;;  %v25_v11 = vld [vmem:[%s253_s1 + $0x38] sm:$0xff]  ;;  %v28_v12 = vld [vmem:[%s253_s1 + $0x50] sm:$0xff]  ;;  %v26_v13 = vld [vmem:[%s253_s1 + $0x40] sm:$0xff]  ;;  %v39_v24 = vshrl.u32 %v38_v23, 7 }
   0x4   :  { %57 = vmatprep.subr.bf16.mxu0 %v31_v4  ;;  %v34_v14 = vpack.c.bf16 %v28_v12, %v25_v11  ;;  %v29_v15 = vld [vmem:[%s253_s1 + $0x58] sm:$0xff]  ;;  %v24_v16 = vld [vmem:[%s253_s1 + $0x30] sm:$0xff]  ;;  %v27_v17 = vld [vmem:[%s253_s1 + $0x48] sm:$0xff] }
   0x5   :  { %157 = vmatpush3.bf16.msra.mxu1 %v32_v9  ;;  %58 = vmatpush1.bf16.msra.mxu0 %v30_v10  ;;  %v35_v18 = vpack.c.bf16 %v29_v15, %v26_v13  ;;  %v33_v19 = vpack.c.bf16 %v27_v17, %v24_v16  ;;  %v15_v20 = vld [vmem:[%s254_s0] sm:$0xff]  ;;  %v16_v21 = vld [vmem:[%s254_s0 + $0x8] sm:$0xff]  ;;  %v48_v25 = vsub.s32 2, %v39_v24  ;;  %v40_v26 = vsub.s32 0, %v39_v24 }
   0x6   :  { %158 = vmatprep.subr.bf16.mxu1 %v167_v0  ;;  %59 = vmatprep.subr.bf16.mxu0 %v34_v14  ;;  %v17_v22 = vpack.c.bf16 %v16_v21, %v15_v20  ;;  %v36_v27 = vld [vmem:[%s255_s2] sm:$0x7]  ;;  %v44_v28 = vsub.s32 1, %v39_v24 }
   0x7   :  { %v49_v29 = vrot.slane %v36_v27, %v48_v25  ;;  %v41_v30 = vrot.slane %v36_v27, %v40_v26 }
   0x8   :  { %v45_v31 = vrot.slane %v36_v27, %v44_v28 }
   0x9   :  { %159 = vmatpush3.bf16.msra.mxu1 %v35_v18  ;;  %60 = vmatpush1.bf16.msra.mxu0 %v33_v19 }
   0xc   :  { %161 = vmatmul.mubr.msk.bf16.vlgmr.msra.gmra.mrb[0].mxu1 %vm53_vm1, %v17_v22  ;;  %151 = vmatmul.mubr.msk.bf16.vlgmr.msra.gmra.mrb[0].mxu0 %vm53_vm1, %v17_v22 }
  0xdf   :  { %v134_v32 = vpop.f32.mrb[0].mxu1  ;;  %v91_v33 = vpop.f32.mrb[0].mxu0 }
  0xe0   :  { %v135_v34 = vadd.f32 %v134_v32, %v49_v29  ;;  %v92_v35 = vadd.f32 %v91_v33, %v41_v30  ;;  %v162_v36 = vpop.f32.mrb[1].mxu1  ;;  %v93_v37 = vpop.f32.mrb[1].mxu0 }
  0xe1   :  { %v94_v38 = vadd.f32 %v93_v37, %v45_v31  ;;  %v137_v39 = vpop.f32.mrb[2].mxu1  ;;  %v95_v40 = vpop.f32.mrb[2].mxu0 }
  0xe2   :  { %143 = vst [vmem:[%s256_s3 + $0x10] sm:$0xff] %v135_v34  ;;  %141 = vst [vmem:[%s256_s3] sm:$0xff] %v92_v35  ;;  %v138_v41 = vadd.f32 %v137_v39, %v49_v29  ;;  %v96_v42 = vadd.f32 %v95_v40, %v41_v30  ;;  %v163_v43 = vpop.f32.mrb[3].mxu1  ;;  %v97_v44 = vpop.f32.mrb[3].mxu0 }
  0xe3   :  { %142 = vst [vmem:[%s256_s3 + $0x8] sm:$0xff] %v94_v38  ;;  %v98_v45 = vadd.f32 %v97_v44, %v45_v31 }
  0xe4   :  { %146 = vst [vmem:[%s256_s3 + $0x28] sm:$0xff] %v138_v41  ;;  %144 = vst [vmem:[%s256_s3 + $0x18] sm:$0xff] %v96_v42 }
  0xe5   :  { %145 = vst [vmem:[%s256_s3 + $0x20] sm:$0xff] %v98_v45 }

// kernel: ipa_forward.5
= control target key start
LH: loop header
LB: loop body
LE: loop exit
PB: predicated region body
PF: predicated region fallthrough
CT: control target
= control target key end

     0   :  { %s494_s12 = smov 0   ;;  %s566_s0 = inlined_call_operand.vmem [shape: f32[256,8], index: 0, kind: input, shape index: {}]   ;;  %s567_s1 = inlined_call_operand.vmem [shape: f32[8,4], index: 1, kind: input, shape index: {}]   ;;  %s568_s2 = inlined_call_operand.vmem [shape: f32[1,4], index: 2, kind: input, shape index: {}]   ;;  %s569_s3 = inlined_call_operand.vmem [shape: f32[256,4], index: 3, kind: output, shape index: {}]  }
   0x1 LB: > { %s407_s13 = sadd.s32 4294967295, %s472_s12   ;;  %p411_p0 = scmp.ge.s32.totalorder %s472_s12, 1  ;;  %s472_s12 = sphi %s494_s12, %s13_s12  }
   0x2   : > { %p138_p1 = scmp.lt.s32.totalorder %s472_s12, 3 }
   0x4   : > { %p139_p2 = pnand %p411_p0, %p138_p1 }
   0x5   : > { %v199_v0 = vld [vmem:[%s567_s1] sm:$0xff] (!%p139_p2)  ;;  %vm233_vm0 = vcmask (!%p139_p2), 1043456   ;;  %s412_s16 = sshll.u32 (!%p139_p2), %s407_s13, 4  ;;  %vm208_vm1 = vcmask (!%p139_p2), 64512   ;;  %vm334_vm2 = vcmask (!%p139_p2), 31744  }
   0x6   : > { %142 = sbr.rel (%p139_p2) target bundleno = 247 (0xf7), region = 32  ;;  %v200_v1 = vpack.c.bf16 (!%p139_p2), %v199_v0, %v199_v0  ;;  %p163_p3 = scmp.lt.s32.totalorder (!%p139_p2), %s412_s16, 31  ;;  %v416_v27 = vld [vmem:[%s568_s2] ss:$0 sm:$0xff] (!%p139_p2) }
   0x8   : > { %456 = vmatprep.subr.msk.bf16.mxu0 (!%p139_p2), %vm233_vm0, %v200_v1  ;;  %457 = vmatprep.subr.msk.bf16.mxu1 (!%p139_p2), %vm233_vm0, %v200_v1  ;;  %v235_v2 = vsel (!%p139_p2), %vm233_vm0, %v200_v1, 0 }
   0x9   : > { %437 = vmatpush3.bf16.msra.mxu0 (!%p139_p2), %v235_v2  ;;  %455 = vmatpush3.bf16.msra.mxu1 (!%p139_p2), %v235_v2 }
   0xd   : > { %s571_s16 = smov (!%p163_p3, %s412_s16), 31 }
   0xe   : > { %s413_s17 = sshll.u32 %s571_s16, 3 }
   0xf   : > { %s166_s20 = scalar_lea.vmem %s566_s0, %s413_s17  ;;  %s529_s25 = scalar_lea.vmem %s569_s3, %s413_s17 }
  0x10   : > { %v175_v3 = vld [vmem:[%s166_s20] sm:$0xff]  ;;  %v176_v4 = vld [vmem:[%s166_s20 + $0x8] sm:$0xff]  ;;  %v177_v8 = vld [vmem:[%s166_s20 + $0x10] sm:$0xff] }
  0x11   : > { %v183_v5 = vld [vmem:[%s166_s20 + $0x40] sm:$0xff]  ;;  %v191_v6 = vpack.c.bf16 %v176_v4, %v175_v3  ;;  %v184_v7 = vld [vmem:[%s166_s20 + $0x48] sm:$0xff]  ;;  %v178_v9 = vld [vmem:[%s166_s20 + $0x18] sm:$0xff] }
  0x12   : > { %v195_v10 = vpack.c.bf16 %v184_v7, %v183_v5  ;;  %v192_v11 = vpack.c.bf16 %v178_v9, %v177_v8  ;;  %v185_v12 = vld [vmem:[%s166_s20 + $0x50] sm:$0xff]  ;;  %v186_v13 = vld [vmem:[%s166_s20 + $0x58] sm:$0xff]  ;;  %v179_v14 = vld [vmem:[%s166_s20 + $0x20] sm:$0xff] }
  0x13   : > { %438 = vmatprep.mubr.msk.bf16.mxu0 %vm208_vm1, %v191_v6  ;;  %v196_v15 = vpack.c.bf16 %v186_v13, %v185_v12  ;;  %v180_v16 = vld [vmem:[%s166_s20 + $0x28] sm:$0xff]  ;;  %v187_v17 = vld [vmem:[%s166_s20 + $0x60] sm:$0xff]  ;;  %v181_v21 = vld [vmem:[%s166_s20 + $0x30] sm:$0xff] }
  0x14   : > { %v188_v18 = vld [vmem:[%s166_s20 + $0x68] sm:$0xff]  ;;  %446 = vmatprep.mubr.msk.bf16.mxu1 %vm208_vm1, %v195_v10  ;;  %439 = vmatmul.mubr.msk.bf16.vlgmr.msra.gmra.mrb[0].mxu0 %vm208_vm1, %v192_v11  ;;  %v193_v19 = vpack.c.bf16 %v180_v16, %v179_v14  ;;  %v182_v22 = vld [vmem:[%s166_s20 + $0x38] sm:$0xff]  ;;  %v189_v23 = vld [vmem:[%s166_s20 + $0x70] sm:$0xff] }
  0x15   : > { %v197_v20 = vpack.c.bf16 %v188_v18, %v187_v17  ;;  %447 = vmatmul.mubr.msk.bf16.vlgmr.msra.gmra.mrb[0].mxu1 %vm208_vm1, %v196_v15  ;;  %v190_v24 = vld [vmem:[%s166_s20 + $0x78] sm:$0xff]  ;;  %v194_v25 = vpack.c.bf16 %v182_v22, %v181_v21 }
  0x16   : > { %442 = vmatprep.mubr.msk.bf16.mxu0 %vm208_vm1, %v193_v19  ;;  %v198_v26 = vpack.c.bf16 %v190_v24, %v189_v23 }
  0x17   : > { %450 = vmatprep.mubr.msk.bf16.mxu1 %vm208_vm1, %v197_v20 }
  0x1c   : > { %443 = vmatmul.mubr.msk.bf16.gmra.mrb[4].mxu0 %vm208_vm1, %v194_v25 }
  0x1d   : > { %451 = vmatmul.mubr.msk.bf16.gmra.mrb[4].mxu1 %vm208_vm1, %v198_v26 }
  0xe7   : > { %v440_v28 = vpop.f32.mrb[0].mxu0 }
  0xe8   : > { %v280_v29 = vadd.f32 %v440_v28, %v416_v27  ;;  %v448_v30 = vpop.f32.mrb[0].mxu1  ;;  %v271_v31 = vpop.f32.mrb[1].mxu0 }
  0xe9   : > { %v312_v32 = vadd.f32 %v448_v30, %v416_v27  ;;  %v272_v33 = vadd.f32 %v416_v27, %v271_v31  ;;  %v303_v34 = vpop.f32.mrb[1].mxu1  ;;  %v441_v35 = vpop.f32.mrb[2].mxu0 }
  0xea   : > { %337 = vst.msk [vmem:[%s529_s25 + $0x10] sm:$0xff] %vm334_vm2, %v280_v29  ;;  %v304_v36 = vadd.f32 %v416_v27, %v303_v34  ;;  %v283_v37 = vadd.f32 %v441_v35, %v416_v27  ;;  %v449_v38 = vpop.f32.mrb[2].mxu1  ;;  %v274_v39 = vpop.f32.mrb[3].mxu0 }
  0xeb   : > { %345 = vst.msk [vmem:[%s529_s25 + $0x50] sm:$0xff] %vm334_vm2, %v312_v32  ;;  %335 = vst.msk [vmem:[%s529_s25] sm:$0xff] %vm334_vm2, %v272_v33  ;;  %v315_v40 = vadd.f32 %v449_v38, %v416_v27  ;;  %v275_v41 = vadd.f32 %v416_v27, %v274_v39  ;;  %v306_v42 = vpop.f32.mrb[3].mxu1 }
  0xec   : > { %343 = vst.msk [vmem:[%s529_s25 + $0x40] sm:$0xff] %vm334_vm2, %v304_v36  ;;  %338 = vst.msk [vmem:[%s529_s25 + $0x18] sm:$0xff] %vm334_vm2, %v283_v37  ;;  %v307_v43 = vadd.f32 %v416_v27, %v306_v42 }
  0xed   : > { %346 = vst.msk [vmem:[%s529_s25 + $0x58] sm:$0xff] %vm334_vm2, %v315_v40  ;;  %336 = vst.msk [vmem:[%s529_s25 + $0x8] sm:$0xff] %vm334_vm2, %v275_v41 }
  0xee   : > { %344 = vst.msk [vmem:[%s529_s25 + $0x48] sm:$0xff] %vm334_vm2, %v307_v43 }
  0xef   : > { %v444_v44 = vpop.f32.mrb[4].mxu0 }
  0xf0   : > { %v296_v45 = vadd.f32 %v444_v44, %v416_v27  ;;  %v452_v46 = vpop.f32.mrb[4].mxu1  ;;  %v287_v47 = vpop.f32.mrb[5].mxu0 }
  0xf1   : > { %v328_v48 = vadd.f32 %v452_v46, %v416_v27  ;;  %v288_v49 = vadd.f32 %v416_v27, %v287_v47  ;;  %v319_v50 = vpop.f32.mrb[5].mxu1  ;;  %v445_v51 = vpop.f32.mrb[6].mxu0 }
  0xf2   : > { %341 = vst.msk [vmem:[%s529_s25 + $0x30] sm:$0xff] %vm334_vm2, %v296_v45  ;;  %v320_v52 = vadd.f32 %v416_v27, %v319_v50  ;;  %v299_v53 = vadd.f32 %v445_v51, %v416_v27  ;;  %v453_v54 = vpop.f32.mrb[6].mxu1  ;;  %v290_v55 = vpop.f32.mrb[7].mxu0 }
  0xf3   : > { %349 = vst.msk [vmem:[%s529_s25 + $0x70] sm:$0xff] %vm334_vm2, %v328_v48  ;;  %339 = vst.msk [vmem:[%s529_s25 + $0x20] sm:$0xff] %vm334_vm2, %v288_v49  ;;  %v331_v56 = vadd.f32 %v453_v54, %v416_v27  ;;  %v291_v57 = vadd.f32 %v416_v27, %v290_v55  ;;  %v322_v58 = vpop.f32.mrb[7].mxu1 }
  0xf4   : > { %347 = vst.msk [vmem:[%s529_s25 + $0x60] sm:$0xff] %vm334_vm2, %v320_v52  ;;  %342 = vst.msk [vmem:[%s529_s25 + $0x38] sm:$0xff] %vm334_vm2, %v299_v53  ;;  %v323_v59 = vadd.f32 %v416_v27, %v322_v58 }
  0xf5   : > { %350 = vst.msk [vmem:[%s529_s25 + $0x78] sm:$0xff] %vm334_vm2, %v331_v56  ;;  %340 = vst.msk [vmem:[%s529_s25 + $0x28] sm:$0xff] %vm334_vm2, %v291_v57 }
  0xf6   : > { %348 = vst.msk [vmem:[%s529_s25 + $0x68] sm:$0xff] %vm334_vm2, %v323_v59 }
  0xf7 PF: > { %s13_s12 = sadd.s32 1, %s472_s12  }
  0xf8   : > { %p10_p4 = scmp.ge.s32.totalorder %s13_s12, 4  }
  0xfa   :  { %12 = sbr.rel (!%p10_p4) target bundleno = 1 (0x1), region = 62 }

// kernel: ipa_forward.7
= control target key start
LH: loop header
LB: loop body
LE: loop exit
PB: predicated region body
PF: predicated region fallthrough
CT: control target
= control target key end

     0   :  { %v165_v3 = vmov 0   ;;  %vm71_vm0 = vcmask 785408   ;;  %s314_s0 = inlined_call_operand.vmem [shape: f32[16,224], index: 0, kind: input, shape index: {}]   ;;  %s315_s1 = inlined_call_operand.vmem [shape: f32[224,32], index: 1, kind: input, shape index: {}]   ;;  %s316_s2 = inlined_call_operand.vmem [shape: f32[1,32], index: 2, kind: input, shape index: {}]   ;;  %s317_s3 = inlined_call_operand.hbm [shape: f32[16,32], index: 3, kind: output, shape index: {}]  }
   0x1   :  { %v22_v0 = vld [vmem:[%s315_s1] sm:$0xff]  ;;  %v23_v1 = vld [vmem:[%s315_s1 + $0x8] sm:$0xff]  ;;  %v24_v2 = vld [vmem:[%s315_s1 + $0x10] sm:$0xff]  ;;  %75 = vmatprep.subr.bf16.mxu0 %v165_v3 }
   0x2   :  { %v50_v4 = vpack.c.bf16 %v23_v1, %v22_v0  ;;  %v25_v5 = vld [vmem:[%s315_s1 + $0x18] sm:$0xff]  ;;  %v26_v7 = vld [vmem:[%s315_s1 + $0x20] sm:$0xff]  ;;  %v27_v8 = vld [vmem:[%s315_s1 + $0x28] sm:$0xff] }
   0x3   :  { %v51_v6 = vpack.c.bf16 %v25_v5, %v24_v2  ;;  %v52_v9 = vpack.c.bf16 %v27_v8, %v26_v7  ;;  %v28_v10 = vld [vmem:[%s315_s1 + $0x30] sm:$0xff]  ;;  %v29_v11 = vld [vmem:[%s315_s1 + $0x38] sm:$0xff]  ;;  %v17_v12 = vld [vmem:[%s314_s0 + $0x8] sm:$0xff] }
   0x4   :  { %76 = vmatpush1.bf16.msra.mxu0 %v50_v4  ;;  %v19_v13 = vld [vmem:[%s314_s0 + $0x18] sm:$0xff]  ;;  %v53_v15 = vpack.c.bf16 %v29_v11, %v28_v10 }
   0x5   :  { %77 = vmatprep.subr.bf16.mxu0 %v165_v3  ;;  %v21_v14 = vpack.c.bf16 %v19_v13, %v17_v12 }
   0x8   :  { %78 = vmatpush1.bf16.msra.mxu0 %v51_v6 }
   0x9   :  { %79 = vmatprep.subr.bf16.mxu0 %v165_v3 }
   0xc   :  { %80 = vmatpush1.bf16.msra.mxu0 %v52_v9 }
   0xd   :  { %8 = vsyncpa [#allocation3], 0  ;;  %81 = vmatprep.subr.bf16.mxu0 %v165_v3  ;;  %v30_v16 = vld [vmem:[%s315_s1 + $0x40] sm:$0xff]  ;;  %v31_v17 = vld [vmem:[%s315_s1 + $0x48] sm:$0xff]  ;;  %136 = vmatprep.mubr.msk.bf16.mxu0 %vm71_vm0, %v21_v14  ;;  %vm116_vm1 = vcmask 261120  }
   0xe   :  { %v54_v18 = vpack.c.bf16 %v31_v17, %v30_v16  ;;  %v32_v19 = vld [vmem:[%s315_s1 + $0x50] sm:$0xff]  ;;  %v33_v20 = vld [vmem:[%s315_s1 + $0x58] sm:$0xff]  ;;  %v34_v22 = vld [vmem:[%s315_s1 + $0x60] sm:$0xff] }
   0xf   :  { %v55_v21 = vpack.c.bf16 %v33_v20, %v32_v19  ;;  %v35_v23 = vld [vmem:[%s315_s1 + $0x68] sm:$0xff]  ;;  %v36_v25 = vld [vmem:[%s315_s1 + $0x70] sm:$0xff]  ;;  %v37_v26 = vld [vmem:[%s315_s1 + $0x78] sm:$0xff] }
  0x10   :  { %82 = vmatpush1.bf16.msra.mxu0 %v53_v15  ;;  %v56_v24 = vpack.c.bf16 %v35_v23, %v34_v22  ;;  %v57_v27 = vpack.c.bf16 %v37_v26, %v36_v25  ;;  %v38_v28 = vld [vmem:[%s315_s1 + $0x80] sm:$0xff]  ;;  %v39_v29 = vld [vmem:[%s315_s1 + $0x88] sm:$0xff]  ;;  %v40_v31 = vld [vmem:[%s315_s1 + $0x90] sm:$0xff] }
  0x11   :  { %83 = vmatprep.subr.bf16.mxu0 %v165_v3  ;;  %v58_v30 = vpack.c.bf16 %v39_v29, %v38_v28  ;;  %v41_v32 = vld [vmem:[%s315_s1 + $0x98] sm:$0xff]  ;;  %v42_v34 = vld [vmem:[%s315_s1 + $0xa0] sm:$0xff]  ;;  %v43_v35 = vld [vmem:[%s315_s1 + $0xa8] sm:$0xff] }
  0x12   :  { %v59_v33 = vpack.c.bf16 %v41_v32, %v40_v31  ;;  %v60_v36 = vpack.c.bf16 %v43_v35, %v42_v34  ;;  %v44_v37 = vld [vmem:[%s315_s1 + $0xb0] sm:$0xff]  ;;  %v45_v38 = vld [vmem:[%s315_s1 + $0xb8] sm:$0xff]  ;;  %v46_v40 = vld [vmem:[%s315_s1 + $0xc0] sm:$0xff] }
  0x13   :  { %v61_v39 = vpack.c.bf16 %v45_v38, %v44_v37  ;;  %v47_v41 = vld [vmem:[%s315_s1 + $0xc8] sm:$0xff]  ;;  %v48_v43 = vld [vmem:[%s315_s1 + $0xd0] sm:$0xff]  ;;  %v49_v44 = vld [vmem:[%s315_s1 + $0xd8] sm:$0xff]  ;;  %s166_s1 = smov [#allocation2]  }
  0x14   :  { %84 = vmatpush1.bf16.msra.mxu0 %v54_v18  ;;  %v62_v42 = vpack.c.bf16 %v47_v41, %v46_v40  ;;  %v63_v45 = vpack.c.bf16 %v49_v44, %v48_v43  ;;  %v16_v46 = vld [vmem:[%s314_s0] sm:$0xff]  ;;  %v18_v47 = vld [vmem:[%s314_s0 + $0x10] sm:$0xff]  ;;  %s124_s24 = sshll.u32 %s166_s1, 4  ;;  %s125_s24 = int_to_ptr.vmem [resolvable:$true] %s124_s24 }
  0x15   :  { %85 = vmatprep.subr.bf16.mxu0 %v165_v3  ;;  %v20_v48 = vpack.c.bf16 %v18_v47, %v16_v46  ;;  %v135_v49 = vld [vmem:[%s316_s2] ss:$0 sm:$0xff]  ;;  %s141_s0 = scalar_lea.vmem %s125_s24, 256  ;;  %p146_p1 = scmp.lt.s32.totalorder %s125_s24, %s125_s24 }
  0x16   :  { %p142_p0 = scmp.ne.s32.totalorder %s125_s24, %s141_s0  ;;  %p147_p2 = scmp.lt.s32.totalorder %s141_s0, %s141_s0 }
  0x18   :  { %86 = vmatpush1.bf16.msra.mxu0 %v55_v21  ;;  %p148_p3 = por %p147_p2, %p146_p1 }
  0x19   :  { %87 = vmatprep.subr.bf16.mxu0 %v165_v3 }
  0x1a   :  { %p149_p4 = pnand %p148_p3, %p142_p0 }
  0x1c   :  { %88 = vmatpush1.bf16.msra.mxu0 %v56_v24 }
  0x1d   :  { %89 = vmatprep.subr.bf16.mxu0 %v165_v3 }
  0x20   :  { %90 = vmatpush1.bf16.msra.mxu0 %v57_v27 }
  0x21   :  { %91 = vmatprep.subr.bf16.mxu0 %v165_v3 }
  0x24   :  { %92 = vmatpush1.bf16.msra.mxu0 %v58_v30 }
  0x25   :  { %93 = vmatprep.subr.bf16.mxu0 %v165_v3 }
  0x28   :  { %94 = vmatpush1.bf16.msra.mxu0 %v59_v33 }
  0x29   :  { %95 = vmatprep.subr.bf16.mxu0 %v165_v3 }
  0x2c   :  { %96 = vmatpush1.bf16.msra.mxu0 %v60_v36 }
  0x2d   :  { %97 = vmatprep.subr.bf16.mxu0 %v165_v3 }
  0x30   :  { %98 = vmatpush1.bf16.msra.mxu0 %v61_v39 }
  0x31   :  { %99 = vmatprep.subr.bf16.mxu0 %v165_v3 }
  0x34   :  { %100 = vmatpush1.bf16.msra.mxu0 %v62_v42 }
  0x35   :  { %101 = vmatprep.subr.bf16.mxu0 %v165_v3 }
  0x38   :  { %102 = vmatpush1.bf16.msra.mxu0 %v63_v45 }
  0x3b   :  { %108 = vmatmul.mubr.bf16.vlgmr.msra.gmra.mrb[0].mxu0 %v20_v48 }
 0x10e   :  { %v109_v50 = vpop.f32.mrb[0].mxu0 }
 0x10f   :  { %v110_v51 = vadd.f32 %v135_v49, %v109_v50  ;;  %v111_v52 = vpop.f32.mrb[1].mxu0 }
 0x110   :  { %v112_v53 = vpop.f32.mrb[2].mxu0 }
 0x111   :  { %117 = vst.msk [vmem:[#allocation2] sm:$0xff] %vm116_vm1, %v110_v51  ;;  %v113_v54 = vadd.f32 %v135_v49, %v112_v53  ;;  %v114_v55 = vpop.f32.mrb[3].mxu0 }
 0x113   :  { %118 = vst.msk [vmem:[#allocation2 + $0x8] sm:$0xff] %vm116_vm1, %v113_v54 }
 0x114   :  { %152 = shalt.err (!%p149_p4)
}
 0x115   :  { %s153_s26 = scalar_lea.hbm %s317_s3, 256 }
 0x116   :  { %p154_p5 = scmp.ne.s32.totalorder %s317_s3, %s153_s26  ;;  %p157_p6 = scmp.lt.u32.totalorder %s153_s26, %s317_s3 }
 0x118   :  { %p159_p7 = pnand %p157_p6, %p154_p5 }
 0x11a   :  { %162 = shalt.err (!%p159_p7)
}
 0x11b   :  { %s167_s4 = smov 128   ;;  %s168_s5 = smov 8  }
 0x11c   :  { %130 = dma.vmem_to_hbm [thread:$0]  %s125_s24, 256, %s317_s3, [#allocation3], %s167_s4, %s167_s4, %s168_s5  }
 0x11d   :  { %163 = dma.done.wait [#allocation3], 256  }
 0x11e   :  { %164 = vsyncadd [#allocation3], 4294967040 }
 0x11f   :  { %134 = vsyncpa [#allocation3], 1 }

// kernel: ipa_forward.6
= control target key start
LH: loop header
LB: loop body
LE: loop exit
PB: predicated region body
PF: predicated region fallthrough
CT: control target
= control target key end

     0   :  { %s3595_s0 = inlined_call_operand.vmem [shape: f32[4], index: 0, kind: input, shape index: {}]   ;;  %s3596_s1 = inlined_call_operand.vmem [shape: f32[16,192], index: 1, kind: input, shape index: {}]   ;;  %s3597_s2 = inlined_call_operand.vmem [shape: f32[4,16,12], index: 2, kind: input, shape index: {}]   ;;  %s3598_s3 = inlined_call_operand.vmem [shape: f32[4,16,12], index: 3, kind: input, shape index: {}]   ;;  %s3599_s4 = inlined_call_operand.vmem [shape: f32[4,16,24], index: 4, kind: input, shape index: {}]   ;;  %s3600_s5 = inlined_call_operand.vmem [shape: f32[4,16,16], index: 5, kind: input, shape index: {}]   ;;  %s3601_s6 = inlined_call_operand.vmem [shape: f32[16,8,16], index: 6, kind: input, shape index: {}]   ;;  %s3602_s7 = inlined_call_operand.vmem [shape: f32[16,192], index: 7, kind: output, shape index: {}]  }
   0x1   :  { %s12_s26 = sshll.u32 %s3595_s0, 4  ;;  %s13_s26 = int_to_ptr.vmem [resolvable:$true] %s12_s26 }
   0x2   :  { %s2582_s27 = scalar_lea.vmem %s13_s26, 16  ;;  %p2587_p1 = scmp.lt.s32.totalorder %s13_s26, %s13_s26 }
   0x3   :  { %p2583_p0 = scmp.ne.s32.totalorder %s13_s26, %s2582_s27  ;;  %p2588_p2 = scmp.lt.s32.totalorder %s2582_s27, %s2582_s27 }
   0x5   :  { %p2589_p3 = por %p2588_p2, %p2587_p1 }
   0x7   :  { %p2590_p4 = pnand %p2589_p3, %p2583_p0 }
   0x9   :  { %2593 = shalt.err (!%p2590_p4)  }
   0xa   :  { %s2596_s28 = smov [#allocation3]  }
   0xb   :  { %15 = dma.vmem_to_smem %s13_s26, 16, %s2596_s28, [#allocation2] }
   0xc   :  { %2594 = dma.done.wait [#allocation2], 16 }
   0xd   :  { %2595 = vsyncadd [#allocation2], 4294967280 }
   0xe   :  { %17 = sfence }
   0xf   :  { %v43_v0 = vld [vmem:[%s3598_s3] sm:$0xff]  ;;  %vm89_vm0 = vcmask 97280   ;;  %v44_v1 = vld [vmem:[%s3598_s3 + $0x8] sm:$0xff]  ;;  %v33_v5 = vld [vmem:[%s3596_s1 + $0x10] sm:$0xff]  ;;  %s2597_s13 = smov 64   ;;  %s83_s14 = sld [smem:[#allocation3]] }
  0x10   :  { %v31_v2 = vld [vmem:[%s3596_s1] sm:$0xff]  ;;  %v96_v3 = vmul.f32 %v43_v0, %v43_v0  ;;  %v97_v4 = vmul.f32 %v44_v1, %v44_v1  ;;  %v2445_v8 = vpack.i.bf16 %v44_v1, %v43_v0  ;;  %s2598_s15 = smov 16   ;;  %v36_v11 = vld [vmem:[%s3597_s2 + $0x8] sm:$0xff]  ;;  %v2599_v15 = vmov 0.0   ;;  %v2689_v18 = vld [vmem:[%s3598_s3 + $0x10] sm:$0xff]  ;;  %s2354_s18 = sld [smem:[#allocation3 + $0x1]] }
  0x11   :  { %v2664_v6 = vpack.i.bf16 %v33_v5, %v31_v2  ;;  %v35_v10 = vld [vmem:[%s3597_s2] sm:$0xff]  ;;  %2379 = vmatprep.subr.bf16.mxu0 %v2599_v15  ;;  %2385 = vmatprep.subr.bf16.mxu1 %v2599_v15  ;;  %vm2600_vm1 = vmmov 0   ;;  %v535_v20 = vmul.f32 %v2689_v18, %v2689_v18  ;;  %v88_v22 = vmul.f32 %v36_v11, %v36_v11  ;;  %v52_v25 = vld [vmem:[%s3599_s4 + $0x8] sm:$0xff]  ;;  %v46_v54 = vld [vmem:[%s3598_s3 + $0x18] sm:$0xff]  ;;  %s2602_s20 = smov 112   ;;  %s2603_s21 = smov 32  }
  0x12   :  { %v98_v7 = vsel %vm89_vm0, %v96_v3, 0.0  ;;  %v101_v9 = vsel %vm89_vm0, %v97_v4, 0.0  ;;  %2381 = vmatprep.mubr.msk.bf16.mxu0 %vm2600_vm1, %v2599_v15  ;;  %2387 = vmatprep.mubr.msk.bf16.mxu1 %vm2600_vm1, %v2599_v15  ;;  %v87_v17 = vmul.f32 %v35_v10, %v35_v10  ;;  %v51_v24 = vld [vmem:[%s3599_s4] sm:$0xff]  ;;  %vm115_vm2 = vcmask 130048   ;;  %v2738_v60 = vld [vmem:[%s3598_s3 + $0x28] sm:$0xff]  ;;  %v2753_v3 = vld [vmem:[%s3596_s1 + $0x18] sm:$0xff] }
  0x13   :  { %99 = vadd.xlane.f32.xlu0 %v98_v7  ;;  %2441 = vrot.lane.b32.xlu1 %v2664_v6, %s2597_s13  ;;  %v537_v21 = vsel %vm89_vm0, %v535_v20, 0.0  ;;  %v93_v23 = vsel %vm89_vm0, %v88_v22, 0.0  ;;  %v2455_v26 = vpack.i.bf16 %v52_v25, %v51_v24  ;;  %vm118_vm3 = vcmask 228352   ;;  %v2730_v57 = vld [vmem:[%s3598_s3 + $0x20] sm:$0xff]  ;;  %s2605_s22 = smov 80  }
  0x14   :  { %v90_v19 = vsel %vm89_vm0, %v87_v17, 0.0  ;;  %v2705_v39 = vmul.f32 0.25, %v31_v2  ;;  %v2708_v41 = vmul.f32 0.25, %v33_v5  ;;  %vm147_vm4 = vcmask 236544   ;;  %v2748_v2 = vld [vmem:[%s3596_s1 + $0x8] sm:$0xff]  ;;  %v59_v22 = vld [vmem:[%s3600_s5] sm:$0xff] }
  0x15   :  { %s2670_s16 = smul.f32 0.23570226, %s83_s14  ;;  %v536_v55 = vmul.f32 %v46_v54, %v46_v54  ;;  %v985_v58 = vmul.f32 %v2730_v57, %v2730_v57  ;;  %v986_v61 = vmul.f32 %v2738_v60, %v2738_v60  ;;  %s2601_s14 = smov 48   ;;  %vm2000_vm5 = vcmask 1041409  }
  0x16   :  { %s2766_s19 = smul.f32 0.23570226, %s2354_s18  ;;  %vm2002_vm6 = vcmask 1042434   ;;  %vm2004_vm7 = vcmask 1043459   ;;  %vm2006_vm8 = vcmask 1044484   ;;  %vm2008_vm9 = vcmask 1045509  }
  0x17   :  { %102 = vadd.xlane.f32.xlu0 %v101_v9  ;;  %2446 = vrot.lane.b32.xlu1 %v2445_v8, %s2598_s15  ;;  %v104_v12 = vstv %s2670_s16  ;;  %s121_s27 = smul.f32 -0.5, %s2670_s16  ;;  %v540_v56 = vsel %vm89_vm0, %v536_v55, 0.0  ;;  %v987_v59 = vsel %vm89_vm0, %v985_v58, 0.0  ;;  %v990_v62 = vsel %vm89_vm0, %v986_v61, 0.0 }
  0x18   :  { %v105_v13 = vmul.f32 %v104_v12, %v35_v10  ;;  %v106_v14 = vmul.f32 %v104_v12, %v36_v11  ;;  %v50_v10 = vld [vmem:[%s3598_s3 + $0x38] sm:$0xff]  ;;  %s195_s24 = smul.f32 0.5, %s2670_s16  ;;  %s2357_s16 = sld [smem:[#allocation3 + $0x2]]  ;;  %vm2010_vm10 = vcmask 1046534   ;;  %vm2012_vm11 = vcmask 1047559  }
  0x19   :  { %v122_v31 = vstv %s121_s27  ;;  %v1432_v11 = vmul.f32 %v50_v10, %v50_v10  ;;  %s566_s23 = smul.f32 -0.5, %s2766_s19  ;;  %vm2316_vm12 = vcmask 261120   ;;  %vm2319_vm13 = vcmask 392192  }
  0x1a   :  { %v2450_v16 = vpack.i.bf16 %v106_v14, %v105_v13  ;;  %v2771_v13 = vld [vmem:[%s3597_s2 + $0x10] sm:$0xff]  ;;  %v2776_v14 = vld [vmem:[%s3597_s2 + $0x18] sm:$0xff]  ;;  %s637_s26 = smul.f32 0.5, %s2766_s19  ;;  %vm2322_vm14 = vcmask 523264   ;;  %vm2325_vm15 = vcmask 719872  }
  0x1b   :  { %v1436_v12 = vsel %vm89_vm0, %v1432_v11, 0.0 }
  0x1e   :  { %s2796_s8 = smul.f32 0.23570226, %s2357_s16 }
  0x20   :  { %s1085_s30 = smul.f32 0.5, %s2796_s8 }
  0x2d   :  { %2451 = vrot.lane.b32.xlu0 %v2450_v16, %s2598_s15  ;;  %v543_v16 = vstv %s2766_s19 }
  0x2e   :  { %v544_v17 = vmul.f32 %v543_v16, %v2771_v13 }
  0x3b   :  { %91 = vadd.xlane.f32.xlu1 %v90_v19  ;;  %v545_v19 = vmul.f32 %v543_v16, %v2776_v14 }
  0x3d   :  { %v2475_v20 = vpack.i.bf16 %v545_v19, %v544_v17 }
  0x3f   :  { %538 = vadd.xlane.f32.xlu1 %v537_v21  ;;  %v196_v21 = vstv %s195_s24  ;;  %s1014_s24 = smul.f32 -0.5, %s2796_s8 }
  0x4c   :  { %94 = vadd.xlane.f32.xlu0 %v93_v23 }
  0x50   :  { %2456 = vrot.lane.b32.xlu1 %v2455_v26, %s2598_s15  ;;  %541 = vadd.xlane.f32.xlu0 %v540_v56  ;;  %v60_v26 = vld [vmem:[%s3600_s5 + $0x8] sm:$0xff]  ;;  %v2470_v56 = vpack.i.bf16 %v2708_v41, %v2705_v39 }
  0x54   :  { %988 = vadd.xlane.f32.xlu0 %v987_v59 }
  0x58   :  { %991 = vadd.xlane.f32.xlu0 %v990_v62 }
  0x6e   :  { %2461 = vrot.lane.b32.xlu0 %v2664_v6, %s2601_s14 }
  0x85   :  { %v2442_v27 = vpop.permute.xlu1 %2441 }
  0x86   :  { %v2443_v29 = vunpack.i.l.bf16 %v2442_v27  ;;  %v2444_v33 = vunpack.i.h.bf16 %v2442_v27 }
  0x89   :  { %v2447_v28 = vpop.permute.xlu1 %2446 }
  0x8a   :  { %v2448_v30 = vunpack.i.l.bf16 %v2447_v28  ;;  %v2449_v34 = vunpack.i.h.bf16 %v2447_v28 }
  0x8c   :  { %v141_v37 = vsel %vm115_vm2, %v2443_v29, %v2448_v30  ;;  %v142_v40 = vsel %vm115_vm2, %v2444_v33, %v2449_v34 }
  0x8d   :  { %1437 = vadd.xlane.f32.xlu0 %v1436_v12  ;;  %v527_v12 = vmul.f32 %v2771_v13, %v2771_v13 }
  0xa0   :  { %v100_v32 = vpop.xlane.xlu0 %99 }
  0xa1   :  { %v123_v35 = vmul.f32 %v122_v31, %v100_v32 }
  0xa3   :  { %v143_v42 = vsel %vm118_vm3, %v141_v37, %v123_v35  ;;  %2476 = vrot.lane.b32.xlu0 %v2475_v20, %s2598_s15 }
  0xa4   :  { %v103_v36 = vpop.xlane.xlu0 %102 }
  0xa5   :  { %v124_v38 = vmul.f32 %v122_v31, %v103_v36 }
  0xa7   :  { %v144_v43 = vsel %vm118_vm3, %v142_v40, %v124_v38  ;;  %v2465_v40 = vpack.i.bf16 %v46_v54, %v2689_v18  ;;  %v993_v18 = vstv %s2796_s8 }
  0xa8   :  { %v2452_v44 = vpop.permute.xlu0 %2451  ;;  %v146_v45 = vpack.c.bf16 %v144_v43, %v143_v42  ;;  %v49_v42 = vld [vmem:[%s3598_s3 + $0x30] sm:$0xff]  ;;  %s2360_s3 = sld [smem:[#allocation3 + $0x3]] }
  0xa9   :  { %v2454_v46 = vunpack.i.h.bf16 %v2452_v44  ;;  %v2453_v47 = vunpack.i.l.bf16 %v2452_v44  ;;  %v1431_v43 = vmul.f32 %v49_v42, %v49_v42  ;;  %v39_v44 = vld [vmem:[%s3597_s2 + $0x20] sm:$0xff] }
  0xaa   :  { %v152_v48 = vsel %vm147_vm4, %v146_v45, 0  ;;  %v40_v45 = vld [vmem:[%s3597_s2 + $0x28] sm:$0xff] }
  0xab   :  { %v116_v49 = vsel %vm115_vm2, %v2705_v39, %v2453_v47  ;;  %v117_v50 = vsel %vm115_vm2, %v2708_v41, %v2454_v46  ;;  %2380 = vmatpush3.bf16.xpose.msra.mxu0 %v152_v48  ;;  %v994_v46 = vmul.f32 %v993_v18, %v39_v44  ;;  %v995_v47 = vmul.f32 %v993_v18, %v40_v45 }
  0xac   :  { %v119_v51 = vsel %vm118_vm3, %v116_v49, 1.0  ;;  %v120_v52 = vsel %vm118_vm3, %v117_v50, 1.0  ;;  %2397 = vmatprep.subr.bf16.mxu0 %v2599_v15  ;;  %v1433_v48 = vsel %vm89_vm0, %v1431_v43, 0.0  ;;  %v2505_v50 = vpack.i.bf16 %v50_v10, %v49_v42 }
  0xad   :  { %v145_v53 = vpack.c.bf16 %v120_v52, %v119_v51  ;;  %v2495_v49 = vpack.i.bf16 %v995_v47, %v994_v46  ;;  %v41_v51 = vld [vmem:[%s3597_s2 + $0x30] sm:$0xff]  ;;  %v42_v52 = vld [vmem:[%s3597_s2 + $0x38] sm:$0xff]  ;;  %s2604_s2 = smov 96   ;;  %v977_v10 = vmul.f32 %v39_v44, %v39_v44  ;;  %v978_v17 = vmul.f32 %v40_v45, %v40_v45 }
  0xae   :  { %s2814_s18 = smul.f32 0.23570226, %s2360_s3  ;;  %v1424_v19 = vmul.f32 %v42_v52, %v42_v52 }
  0xaf   :  { %2496 = vrot.lane.b32.xlu0 %v2495_v49, %s2598_s15 }
  0xb0   :  { %v1428_v20 = vsel %vm89_vm0, %v1424_v19, 0.0  ;;  %s1460_s25 = smul.f32 -0.5, %s2814_s18 }
  0xb1   :  { %s1531_s10 = smul.f32 0.5, %s2814_s18 }
  0xb2   :  { %2382 = vmatmul.mubr.msk.bf16.vlgmr.msra.gmra.mrb[0].mxu0 %vm147_vm4, %v145_v53  ;;  %v1439_v53 = vstv %s2814_s18 }
  0xb3   :  { %2399 = vmatprep.mubr.msk.bf16.mxu0 %vm2600_vm1, %v2599_v15  ;;  %2506 = vrot.lane.b32.xlu0 %v2505_v50, %s2598_s15  ;;  %v1440_v54 = vmul.f32 %v1439_v53, %v41_v51  ;;  %v1441_v55 = vmul.f32 %v1439_v53, %v42_v52 }
  0xb5   :  { %v2515_v58 = vpack.i.bf16 %v1441_v55, %v1440_v54 }
  0xb7   :  { %2516 = vrot.lane.b32.xlu0 %v2515_v58, %s2598_s15 }
  0xc8   :  { %v92_v63 = vpop.xlane.xlu1 %91 }
  0xc9   :  { %v197_v24 = vmul.f32 %v196_v21, %v92_v63 }
  0xcc   :  { %v2743_v0 = vpop.xlane.xlu1 %538 }
  0xd0   :  { %v2457_v1 = vpop.permute.xlu1 %2456 }
  0xd1   :  { %v2459_v4 = vunpack.i.h.bf16 %v2457_v1  ;;  %v2458_v5 = vunpack.i.l.bf16 %v2457_v1 }
  0xd3   :  { %v233_v7 = vsel %vm115_vm2, %v2748_v2, %v2458_v5  ;;  %v234_v8 = vsel %vm115_vm2, %v2753_v3, %v2459_v4 }
  0xd4   :  { %v236_v9 = vpack.c.bf16 %v234_v8, %v233_v7  ;;  %v2485_v8 = vpack.i.bf16 %v2738_v60, %v2730_v57  ;;  %v979_v57 = vsel %vm89_vm0, %v977_v10, 0.0  ;;  %v1423_v60 = vmul.f32 %v41_v51, %v41_v51 }
  0xd6   :  { %2386 = vmatpush3.bf16.msra.mxu1 %v236_v9  ;;  %v528_v9 = vmul.f32 %v2776_v14, %v2776_v14  ;;  %v1425_v16 = vsel %vm89_vm0, %v1423_v60, 0.0  ;;  %v982_v14 = vsel %vm89_vm0, %v978_v17, 0.0 }
  0xd7   :  { %2391 = vmatprep.subr.bf16.mxu1 %v2599_v15 }
  0xd8   :  { %v532_v11 = vsel %vm89_vm0, %v528_v9, 0.0 }
  0xd9   :  { %v95_v23 = vpop.xlane.xlu0 %94  ;;  %533 = vadd.xlane.f32.xlu0 %v532_v11 }
  0xda   :  { %v198_v29 = vmul.f32 %v196_v21, %v95_v23 }
  0xdd   :  { %980 = vadd.xlane.f32.xlu0 %v979_v57 }
  0xe1   :  { %1426 = vadd.xlane.f32.xlu0 %v1425_v16 }
 0x185   :  { %v188_v25 = vpop.f32.mrb[0].mxu0 }
 0x186   :  { %v189_v27 = vadd.f32 %v188_v25, %v59_v22  ;;  %v2383_v28 = vpop.f32.mrb[1].mxu0  ;;  %v542_v22 = vpop.xlane.xlu0 %541 }
 0x187   :  { %v191_v30 = vpop.f32.mrb[2].mxu0 }
 0x188   :  { %v199_v31 = vsub.f32 %v189_v27, %v197_v24  ;;  %v192_v32 = vadd.f32 %v191_v30, %v60_v26  ;;  %v2384_v33 = vpop.f32.mrb[3].mxu0 }
 0x18a   :  { %v200_v34 = vsub.f32 %v192_v32, %v198_v29  ;;  %v201_v35 = vmul.f32 0.57735026, %v199_v31  ;;  %v989_v13 = vpop.xlane.xlu0 %988 }
 0x18c   :  { %v203_v36 = vsel %vm115_vm2, %v201_v35, -inf  ;;  %v202_v37 = vmul.f32 0.57735026, %v200_v34 }
 0x18d   :  { %204 = vmax.xlane.f32.xlu1 %v203_v36 }
 0x18e   :  { %v206_v38 = vsel %vm115_vm2, %v202_v37, -inf  ;;  %v992_v25 = vpop.xlane.xlu0 %991 }
 0x191   :  { %207 = vmax.xlane.f32.xlu1 %v206_v38 }
 0x192   :  { %v2462_v27 = vpop.permute.xlu0 %2461 }
 0x193   :  { %v2464_v30 = vunpack.i.h.bf16 %v2462_v27  ;;  %v2463_v32 = vunpack.i.l.bf16 %v2462_v27 }
 0x196   :  { %v2851_v29 = vpop.xlane.xlu0 %1437 }
 0x19a   :  { %v2477_v42 = vpop.permute.xlu0 %2476 }
 0x19b   :  { %v2479_v49 = vunpack.i.h.bf16 %v2477_v42  ;;  %v2478_v53 = vunpack.i.l.bf16 %v2477_v42 }
 0x19e   :  { %v2497_v46 = vpop.permute.xlu0 %2496 }
 0x19f   :  { %v2499_v19 = vunpack.i.h.bf16 %v2497_v46 }
 0x1a2   :  { %2466 = vrot.lane.b32.xlu1 %v2465_v40, %s2598_s15 }
 0x1c6   :  { %1434 = vadd.xlane.f32.xlu1 %v1433_v48  ;;  %v1015_v48 = vstv %s1014_s24 }
 0x1d7   :  { %2471 = vrot.lane.b32.xlu1 %v2470_v56, %s2602_s20 }
 0x1db   :  { %2481 = vrot.lane.b32.xlu1 %v2664_v6, %s2603_s21 }
 0x21a   :  { %v205_v59 = vpop.xlane.xlu1 %204 }
 0x21b   :  { %v209_v61 = vsub.f32 %v201_v35, %v205_v59  ;;  %v567_v35 = vstv %s566_s23 }
 0x21c   :  { %v569_v36 = vmul.f32 %v567_v35, %v542_v22  ;;  %v568_v43 = vmul.f32 %v567_v35, %v2743_v0 }
 0x21d   :  { %v211_v62 = vmul.f32 1.442695, %v209_v61 }
 0x21e   :  { %v208_v63 = vpop.xlane.xlu1 %207 }
 0x21f   :  { %2550 = vpow2.f32 %v211_v62  ;;  %v210_v1 = vsub.f32 %v202_v37, %v208_v63 }
 0x221   :  { %v213_v4 = vmul.f32 1.442695, %v210_v1 }
 0x222   :  { %v2467_v21 = vpop.permute.xlu1 %2466 }
 0x223   :  { %2552 = vpow2.f32 %v213_v4  ;;  %v2469_v33 = vunpack.i.h.bf16 %v2467_v21  ;;  %v2468_v34 = vunpack.i.l.bf16 %v2467_v21  ;;  %v1016_v4 = vmul.f32 %v1015_v48, %v989_v13 }
 0x225   :  { %v585_v38 = vsel %vm115_vm2, %v2464_v30, %v2469_v33  ;;  %v584_v40 = vsel %vm115_vm2, %v2463_v32, %v2468_v34 }
 0x226   :  { %v586_v44 = vsel %vm118_vm3, %v584_v40, %v568_v43  ;;  %v587_v45 = vsel %vm118_vm3, %v585_v38, %v569_v36 }
 0x229   :  { %v2823_v5 = vpop.eup %2550 }
 0x22a   :  { %v215_v39 = vsel %vm115_vm2, %v2823_v5, 0.0 }
 0x22b   :  { %216 = vadd.xlane.f32.xlu1 %v215_v39  ;;  %v1017_v39 = vmul.f32 %v1015_v48, %v992_v25 }
 0x22d   :  { %v2827_v41 = vpop.eup %2552 }
 0x22e   :  { %v218_v7 = vsel %vm115_vm2, %v2827_v41, 0.0 }
 0x22f   :  { %219 = vadd.xlane.f32.xlu1 %v218_v7  ;;  %v2507_v7 = vpop.permute.xlu0 %2506 }
 0x230   :  { %v2509_v57 = vunpack.i.h.bf16 %v2507_v7  ;;  %v2508_v60 = vunpack.i.l.bf16 %v2507_v7 }
 0x233   :  { %v2517_v30 = vpop.permute.xlu0 %2516 }
 0x234   :  { %v2518_v36 = vunpack.i.l.bf16 %v2517_v30 }
 0x240   :  { %2486 = vrot.lane.b32.xlu1 %v2485_v8, %s2598_s15 }
 0x244   :  { %2491 = vrot.lane.b32.xlu1 %v2470_v56, %s2604_s2 }
 0x248   :  { %2501 = vrot.lane.b32.xlu1 %v2664_v6, %s2598_s15  ;;  %v529_v6 = vsel %vm89_vm0, %v527_v12, 0.0  ;;  %vm2328_vm0 = vcmask 916480  }
 0x24c   :  { %2511 = vrot.lane.b32.xlu1 %v2470_v56, %s2605_s22  ;;  %v589_v56 = vpack.c.bf16 %v587_v45, %v586_v44 }
 0x253   :  { %v2848_v23 = vpop.xlane.xlu1 %1434 }
 0x257   :  { %v2472_v24 = vpop.permute.xlu1 %2471 }
 0x258   :  { %v2474_v54 = vunpack.i.h.bf16 %v2472_v24  ;;  %v2473_v55 = vunpack.i.l.bf16 %v2472_v24 }
 0x25a   :  { %v563_v9 = vsel %vm115_vm2, %v2474_v54, %v2479_v49  ;;  %v638_v54 = vstv %s637_s26 }
 0x25b   :  { %v2482_v26 = vpop.permute.xlu1 %2481  ;;  %v565_v17 = vsel %vm118_vm3, %v563_v9, 1.0 }
 0x25c   :  { %v2484_v58 = vunpack.i.h.bf16 %v2482_v26  ;;  %v2483_v0 = vunpack.i.l.bf16 %v2482_v26 }
 0x270   :  { %530 = vadd.xlane.f32.xlu1 %v529_v6  ;;  %v1461_v6 = vstv %s1460_s25 }
 0x271   :  { %v1463_v24 = vmul.f32 %v1461_v6, %v2851_v29 }
 0x274   :  { %983 = vadd.xlane.f32.xlu1 %v982_v14 }
 0x278   :  { %1429 = vadd.xlane.f32.xlu1 %v1428_v20  ;;  %v2498_v20 = vunpack.i.l.bf16 %v2497_v46 }
 0x2b8   :  { %v217_v28 = vpop.xlane.xlu1 %216 }
 0x2b9   :  { %2554 = vrcp.f32 %v217_v28  ;;  %v1462_v28 = vmul.f32 %v1461_v6, %v2848_v23  ;;  %v2519_v23 = vunpack.i.h.bf16 %v2517_v30 }
 0x2bc   :  { %v220_v31 = vpop.xlane.xlu1 %219 }
 0x2bd   :  { %2556 = vrcp.f32 %v220_v31 }
 0x2c0   :  { %v2487_v37 = vpop.permute.xlu1 %2486 }
 0x2c1   :  { %v2489_v50 = vunpack.i.h.bf16 %v2487_v37  ;;  %v2488_v51 = vunpack.i.l.bf16 %v2487_v37 }
 0x2c3   :  { %v2555_v18 = vpop.eup %2554  ;;  %v1032_v62 = vsel %vm115_vm2, %v2483_v0, %v2488_v51  ;;  %v1033_v63 = vsel %vm115_vm2, %v2484_v58, %v2489_v50  ;;  %v534_v58 = vpop.xlane.xlu0 %533 }
 0x2c4   :  { %v2492_v47 = vpop.permute.xlu1 %2491  ;;  %v2860_v59 = vmul.f32 %v2555_v18, %v2823_v5  ;;  %v562_v5 = vsel %vm115_vm2, %v2473_v55, %v2478_v53  ;;  %v1034_v10 = vsel %vm118_vm3, %v1032_v62, %v1016_v4  ;;  %v1035_v11 = vsel %vm118_vm3, %v1033_v63, %v1017_v39  ;;  %v62_v63 = vld [vmem:[%s3600_s5 + $0x18] sm:$0xff] }
 0x2c5   :  { %v564_v14 = vsel %vm118_vm3, %v562_v5, 1.0  ;;  %v2494_v21 = vunpack.i.h.bf16 %v2492_v47  ;;  %v2493_v22 = vunpack.i.l.bf16 %v2492_v47  ;;  %v1037_v13 = vpack.c.bf16 %v1035_v11, %v1034_v10 }
 0x2c6   :  { %v588_v25 = vpack.c.bf16 %v565_v17, %v564_v14  ;;  %v640_v39 = vmul.f32 %v638_v54, %v534_v58  ;;  %v2944_v58 = vpack.i.bf16 %v2753_v3, %v2748_v2 }
 0x2c7   :  { %v2557_v52 = vpop.eup %2556  ;;  %v1011_v32 = vsel %vm115_vm2, %v2494_v21, %v2499_v19  ;;  %v1010_v33 = vsel %vm115_vm2, %v2493_v22, %v2498_v20  ;;  %v1042_v34 = vsel %vm147_vm4, %v1037_v13, 0  ;;  %v981_v10 = vpop.xlane.xlu0 %980  ;;  %v64_v19 = vld [vmem:[%s3600_s5 + $0x28] sm:$0xff] }
 0x2c8   :  { %v2863_v61 = vmul.f32 %v2557_v52, %v2827_v41  ;;  %v2502_v8 = vpop.permute.xlu1 %2501  ;;  %v594_v41 = vsel %vm147_vm4, %v589_v56, 0  ;;  %v1013_v40 = vsel %vm118_vm3, %v1011_v32, 1.0  ;;  %v1012_v42 = vsel %vm118_vm3, %v1010_v33, 1.0  ;;  %v61_v56 = vld [vmem:[%s3600_s5 + $0x10] sm:$0xff] }
 0x2c9   :  { %v2504_v12 = vunpack.i.h.bf16 %v2502_v8  ;;  %v2503_v16 = vunpack.i.l.bf16 %v2502_v8  ;;  %v1036_v44 = vpack.c.bf16 %v1013_v40, %v1012_v42  ;;  %v65_v33 = vld [vmem:[%s3600_s5 + $0x30] sm:$0xff] }
 0x2ca   :  { %v235_v1 = vpack.c.bf16 %v2863_v61, %v2860_v59 }
 0x2cb   :  { %v1479_v26 = vsel %vm115_vm2, %v2504_v12, %v2509_v57  ;;  %v1478_v27 = vsel %vm115_vm2, %v2503_v16, %v2508_v60  ;;  %v63_v60 = vld [vmem:[%s3600_s5 + $0x20] sm:$0xff]  ;;  %v1427_v30 = vpop.xlane.xlu0 %1426 }
 0x2cc   :  { %2388 = vmatmul.mubr.msk.bf16.vlgmr.msra.gmra.mrb[0].mxu1 %vm115_vm2, %v235_v1  ;;  %v2512_v31 = vpop.permute.xlu1 %2511  ;;  %v1480_v29 = vsel %vm118_vm3, %v1478_v27, %v1462_v28  ;;  %v1481_v35 = vsel %vm118_vm3, %v1479_v26, %v1463_v24  ;;  %v1532_v28 = vstv %s1531_s10 }
 0x2cd   :  { %2392 = vmatpush3.bf16.xpose.msra.mxu1 %v594_v41  ;;  %2393 = vmatprep.mubr.msk.bf16.mxu1 %vm2600_vm1, %v2599_v15  ;;  %v2514_v37 = vunpack.i.h.bf16 %v2512_v31  ;;  %v2513_v38 = vunpack.i.l.bf16 %v2512_v31  ;;  %v1483_v43 = vpack.c.bf16 %v1481_v35, %v1480_v29  ;;  %v1086_v41 = vstv %s1085_s30 }
 0x2ce   :  { %2403 = vmatprep.subr.bf16.mxu1 %v2599_v15  ;;  %v1087_v16 = vmul.f32 %v1086_v41, %v981_v10  ;;  %v1533_v29 = vmul.f32 %v1532_v28, %v1427_v30 }
 0x2cf   :  { %v1457_v45 = vsel %vm115_vm2, %v2514_v37, %v2519_v23  ;;  %v1456_v18 = vsel %vm115_vm2, %v2513_v38, %v2518_v36  ;;  %v1488_v46 = vsel %vm147_vm4, %v1483_v43, 0  ;;  %v66_v37 = vld [vmem:[%s3600_s5 + $0x38] sm:$0xff] }
 0x2d0   :  { %v1459_v47 = vsel %vm118_vm3, %v1457_v45, 1.0  ;;  %v1458_v48 = vsel %vm118_vm3, %v1456_v18, 1.0  ;;  %vm2336_vm3 = vcmask 326656  }
 0x2d1   :  { %v1482_v49 = vpack.c.bf16 %v1459_v47, %v1458_v48 }
 0x2d4   :  { %2394 = vmatmul.mubr.msk.bf16.vlgmr.msra.gmra.mrb[4].mxu1 %vm147_vm4, %v588_v25 }
 0x2d5   :  { %2404 = vmatpush3.bf16.xpose.msra.mxu1 %v1042_v34  ;;  %2405 = vmatprep.mubr.msk.bf16.mxu1 %vm2600_vm1, %v2599_v15 }
 0x2d6   :  { %2415 = vmatprep.subr.bf16.mxu1 %v2599_v15 }
 0x2dc   :  { %2406 = vmatmul.mubr.msk.bf16.vlgmr.msra.gmra.mrb[8].mxu1 %vm147_vm4, %v1036_v44 }
 0x2dd   :  { %2416 = vmatpush3.bf16.xpose.msra.mxu1 %v1488_v46  ;;  %2417 = vmatprep.mubr.msk.bf16.mxu1 %vm2600_vm1, %v2599_v15 }
 0x2e4   :  { %2418 = vmatmul.mubr.msk.bf16.vlgmr.msra.gmra.mrb[12].mxu1 %vm147_vm4, %v1482_v49 }
 0x2fd   :  { %v531_v55 = vpop.xlane.xlu1 %530 }
 0x2fe   :  { %v639_v0 = vmul.f32 %v638_v54, %v531_v55  ;;  %v53_v54 = vld [vmem:[%s3599_s4 + $0x10] sm:$0xff]  ;;  %v54_v55 = vld [vmem:[%s3599_s4 + $0x18] sm:$0xff] }
 0x301   :  { %v984_v12 = vpop.xlane.xlu1 %983 }
 0x302   :  { %v1088_v22 = vmul.f32 %v1086_v41, %v984_v12 }
 0x305   :  { %v1430_v34 = vpop.xlane.xlu1 %1429 }
 0x306   :  { %v1534_v42 = vmul.f32 %v1532_v28, %v1430_v34 }
 0x39f   :  { %v2905_v50 = vpop.f32.mrb[0].mxu1 }
 0x3a0   :  { %v2389_v51 = vpop.f32.mrb[1].mxu1 }
 0x3a1   :  { %v2908_v52 = vpop.f32.mrb[2].mxu1 }
 0x3a2   :  { %v2390_v53 = vpop.f32.mrb[3].mxu1 }
 0x3a7   :  { %v630_v62 = vpop.f32.mrb[4].mxu1 }
 0x3a8   :  { %v631_v1 = vadd.f32 %v630_v62, %v61_v56  ;;  %v2395_v4 = vpop.f32.mrb[5].mxu1  ;;  %v2525_v56 = vpack.i.bf16 %v54_v55, %v53_v54  ;;  %v56_v62 = vld [vmem:[%s3599_s4 + $0x28] sm:$0xff] }
 0x3a9   :  { %v633_v7 = vpop.f32.mrb[6].mxu1 }
 0x3aa   :  { %v641_v8 = vsub.f32 %v631_v1, %v639_v0  ;;  %v634_v9 = vadd.f32 %v633_v7, %v62_v63  ;;  %v2396_v5 = vpop.f32.mrb[7].mxu1  ;;  %v55_v0 = vld [vmem:[%s3599_s4 + $0x20] sm:$0xff] }
 0x3ab   :  { %v2535_v63 = vpack.i.bf16 %v56_v62, %v55_v0  ;;  %v3014_v62 = vld [vmem:[%s3601_s6 + $0x8] sm:$0xff] }
 0x3ac   :  { %v642_v11 = vsub.f32 %v634_v9, %v640_v39  ;;  %v643_v57 = vmul.f32 0.57735026, %v641_v8 }
 0x3ae   :  { %v645_v6 = vsel %vm115_vm2, %v643_v57, -inf  ;;  %v644_v17 = vmul.f32 0.57735026, %v642_v11 }
 0x3af   :  { %646 = vmax.xlane.f32.xlu0 %v645_v6  ;;  %v1078_v14 = vpop.f32.mrb[8].mxu1 }
 0x3b0   :  { %v1079_v20 = vadd.f32 %v1078_v14, %v63_v60  ;;  %v2407_v21 = vpop.f32.mrb[9].mxu1  ;;  %v648_v13 = vsel %vm115_vm2, %v644_v17, -inf }
 0x3b1   :  { %649 = vmax.xlane.f32.xlu1 %v648_v13  ;;  %v1081_v24 = vpop.f32.mrb[10].mxu1 }
 0x3b2   :  { %v1089_v25 = vsub.f32 %v1079_v20, %v1087_v16  ;;  %v1082_v26 = vadd.f32 %v1081_v24, %v64_v19  ;;  %v2408_v27 = vpop.f32.mrb[11].mxu1 }
 0x3b4   :  { %v1090_v31 = vsub.f32 %v1082_v26, %v1088_v22  ;;  %v1091_v32 = vmul.f32 0.57735026, %v1089_v25 }
 0x3b6   :  { %v1093_v35 = vsel %vm115_vm2, %v1091_v32, -inf  ;;  %v1092_v23 = vmul.f32 0.57735026, %v1090_v31 }
 0x3b7   :  { %1094 = vmax.xlane.f32.xlu0 %v1093_v35  ;;  %v1524_v36 = vpop.f32.mrb[12].mxu1 }
 0x3b8   :  { %v1525_v38 = vadd.f32 %v1524_v36, %v65_v33  ;;  %v2419_v40 = vpop.f32.mrb[13].mxu1  ;;  %v1096_v43 = vsel %vm115_vm2, %v1092_v23, -inf }
 0x3b9   :  { %1097 = vmax.xlane.f32.xlu1 %v1096_v43  ;;  %v1527_v44 = vpop.f32.mrb[14].mxu1  ;;  %v58_v40 = vld [vmem:[%s3599_s4 + $0x38] sm:$0xff]  ;;  %v2606_v43 = vmov 1966171168  }
 0x3ba   :  { %v1535_v45 = vsub.f32 %v1525_v38, %v1533_v29  ;;  %v1528_v18 = vadd.f32 %v1527_v44, %v66_v37  ;;  %v2420_v46 = vpop.f32.mrb[15].mxu1  ;;  %v57_v38 = vld [vmem:[%s3599_s4 + $0x30] sm:$0xff]  ;;  %v285_v44 = vunpack.c.l.s4 %v2606_v43 }
 0x3bc   :  { %v1536_v47 = vsub.f32 %v1528_v18, %v1534_v42  ;;  %v1537_v48 = vmul.f32 0.57735026, %v1535_v45  ;;  %v2545_v42 = vpack.i.bf16 %v58_v40, %v57_v38  ;;  %v287_v45 = vlaneseq }
 0x3bd   :  { %v286_v18 = vunpack.c.0.s8 %v285_v44  ;;  %v3083_v44 = vld [vmem:[%s3601_s6 + $0x40] sm:$0xff] }
 0x3be   :  { %v1539_v49 = vsel %vm115_vm2, %v1537_v48, -inf  ;;  %v1538_v51 = vmul.f32 0.57735026, %v1536_v47  ;;  %v2995_v46 = vshrl.u32 %v287_v45, 7 }
 0x3bf   :  { %1540 = vmax.xlane.f32.xlu0 %v1539_v49 }
 0x3c0   :  { %v1542_v53 = vsel %vm115_vm2, %v1538_v51, -inf  ;;  %v2998_v47 = vsub.s32 %v286_v18, %v2995_v46  ;;  %v3007_v55 = vsub.s32 0, %v2995_v46 }
 0x3c1   :  { %1543 = vmax.xlane.f32.xlu1 %v1542_v53 }
 0x3d2   :  { %2526 = vrot.lane.b32.xlu1 %v2525_v56, %s2598_s15 }
 0x3d5   :  { %2521 = vrot.lane.b32.xlu0 %v2944_v58, %s2602_s20 }
 0x3d6   :  { %2531 = vrot.lane.b32.xlu1 %v2944_v58, %s2604_s2 }
 0x3d9   :  { %2536 = vrot.lane.b32.xlu0 %v2535_v63, %s2598_s15 }
 0x43c   :  { %v647_v2 = vpop.xlane.xlu0 %646 }
 0x43d   :  { %v651_v3 = vsub.f32 %v643_v57, %v647_v2 }
 0x43e   :  { %v650_v1 = vpop.xlane.xlu1 %649 }
 0x43f   :  { %v653_v4 = vmul.f32 1.442695, %v651_v3  ;;  %v652_v39 = vsub.f32 %v644_v17, %v650_v1 }
 0x441   :  { %2558 = vpow2.f32 %v653_v4  ;;  %v655_v7 = vmul.f32 1.442695, %v652_v39 }
 0x443   :  { %2560 = vpow2.f32 %v655_v7 }
 0x444   :  { %v1095_v8 = vpop.xlane.xlu0 %1094 }
 0x445   :  { %v1099_v9 = vsub.f32 %v1091_v32, %v1095_v8  ;;  %v3029_v8 = vld [vmem:[%s3601_s6 + $0x10] sm:$0xff] }
 0x446   :  { %v1098_v5 = vpop.xlane.xlu1 %1097 }
 0x447   :  { %v1101_v41 = vmul.f32 1.442695, %v1099_v9  ;;  %v1100_v10 = vsub.f32 %v1092_v23, %v1098_v5  ;;  %v339_v9 = vrot.slane %v2863_v61, %v2998_v47 }
 0x449   :  { %2562 = vpow2.f32 %v1101_v41  ;;  %v1103_v11 = vmul.f32 1.442695, %v1100_v10  ;;  %v3038_v10 = vld [vmem:[%s3601_s6 + $0x18] sm:$0xff] }
 0x44b   :  { %v2958_v60 = vpop.eup %2558  ;;  %2564 = vpow2.f32 %v1103_v11 }
 0x44c   :  { %v1541_v12 = vpop.xlane.xlu0 %1540  ;;  %v657_v57 = vsel %vm115_vm2, %v2958_v60, 0.0 }
 0x44d   :  { %v2962_v16 = vpop.eup %2560  ;;  %v1545_v6 = vsub.f32 %v1537_v48, %v1541_v12  ;;  %658 = vadd.xlane.f32.xlu0 %v657_v57  ;;  %v290_v48 = vrot.slane %v2860_v59, %v2998_v47 }
 0x44e   :  { %v1544_v17 = vpop.xlane.xlu1 %1543  ;;  %v660_v14 = vsel %vm115_vm2, %v2962_v16, 0.0 }
 0x44f   :  { %v1547_v19 = vmul.f32 1.442695, %v1545_v6  ;;  %v1546_v20 = vsub.f32 %v1538_v51, %v1544_v17  ;;  %661 = vadd.xlane.f32.xlu1 %v660_v14  ;;  %v298_v49 = vcombine.high %v290_v48, %v290_v48  ;;  %v283_v51 = vcombine.high %v2860_v59, %v2860_v59  ;;  %v3020_v59 = vld [vmem:[%s3601_s6] sm:$0xff] }
 0x450   :  { %v2522_v21 = vpop.permute.xlu0 %2521  ;;  %v306_v54 = vrot.slane %v290_v48, %v2998_v47  ;;  %v3047_v14 = vld [vmem:[%s3601_s6 + $0x20] sm:$0xff] }
 0x451   :  { %2566 = vpow2.f32 %v1547_v19  ;;  %v1549_v22 = vmul.f32 1.442695, %v1546_v20  ;;  %v2524_v13 = vunpack.i.h.bf16 %v2522_v21  ;;  %v2523_v24 = vunpack.i.l.bf16 %v2522_v21 }
 0x452   :  { %v2527_v25 = vpop.permute.xlu1 %2526  ;;  %v320_v53 = vrot.slane %v298_v49, %v2998_v47  ;;  %v297_v56 = vrot.slane %v283_v51, %v2998_v47  ;;  %v328_v0 = vcombine.high %v306_v54, %v306_v54  ;;  %v384_v63 = vrot.slane %v306_v54, %v3007_v55  ;;  %v3091_v54 = vld [vmem:[%s3601_s6 + $0x48] sm:$0xff] }
 0x453   :  { %v2966_v26 = vpop.eup %2562  ;;  %2568 = vpow2.f32 %v1549_v22  ;;  %v2529_v27 = vunpack.i.h.bf16 %v2527_v25  ;;  %v2528_v28 = vunpack.i.l.bf16 %v2527_v25  ;;  %v347_v19 = vcombine.high %v339_v9, %v339_v9 }
 0x454   :  { %v1105_v30 = vsel %vm115_vm2, %v2966_v26, 0.0  ;;  %v330_v2 = vcombine.high %v320_v53, %v320_v53  ;;  %v299_v3 = vcombine.high %v297_v56, %v297_v56  ;;  %v392_v4 = vrot.slane %v328_v0, %v3007_v55 }
 0x455   :  { %v2970_v31 = vpop.eup %2564  ;;  %1106 = vadd.xlane.f32.xlu0 %v1105_v30  ;;  %v684_v32 = vsel %vm115_vm2, %v2524_v13, %v2529_v27  ;;  %v683_v33 = vsel %vm115_vm2, %v2523_v24, %v2528_v28  ;;  %v313_v39 = vrot.slane %v297_v56, %v2998_v47  ;;  %v461_v7 = vmul.f32 %v384_v63, %v3020_v59  ;;  %v3056_v24 = vld [vmem:[%s3601_s6 + $0x28] sm:$0xff] }
 0x456   :  { %v1108_v34 = vsel %vm115_vm2, %v2970_v31, 0.0  ;;  %v686_v29 = vpack.c.bf16 %v684_v32, %v683_v33  ;;  %v396_v5 = vrot.slane %v330_v2, %v3007_v55  ;;  %v327_v41 = vrot.slane %v299_v3, %v2998_v47  ;;  %v3065_v32 = vld [vmem:[%s3601_s6 + $0x30] sm:$0xff] }
 0x457   :  { %1109 = vadd.xlane.f32.xlu1 %v1108_v34  ;;  %v463_v12 = vmul.f32 %v392_v4, %v3029_v8  ;;  %v400_v57 = vrot.slane %v313_v39, %v3007_v55  ;;  %v329_v6 = vcombine.high %v313_v39, %v313_v39  ;;  %v477_v17 = vsel %vm115_vm2, %v461_v7, 0.0  ;;  %v3100_v2 = vld [vmem:[%s3601_s6 + $0x50] sm:$0xff]  ;;  %v3109_v7 = vld [vmem:[%s3601_s6 + $0x58] sm:$0xff] }
 0x458   :  { %2398 = vmatpush3.bf16.msra.mxu0 %v686_v29  ;;  %v464_v20 = vmul.f32 %v396_v5, %v3038_v10  ;;  %v404_v21 = vrot.slane %v327_v41, %v3007_v55  ;;  %v331_v22 = vcombine.high %v327_v41, %v327_v41  ;;  %v332_v13 = vcombine.high %v2863_v61, %v2863_v61 }
 0x459   :  { %2409 = vmatprep.subr.bf16.mxu0 %v2599_v15  ;;  %v483_v25 = vsel %vm115_vm2, %v463_v12, 0.0  ;;  %v465_v27 = vmul.f32 %v400_v57, %v3047_v14  ;;  %v408_v28 = vrot.slane %v329_v6, %v3007_v55  ;;  %v355_v30 = vrot.slane %v339_v9, %v2998_v47  ;;  %v3117_v12 = vld [vmem:[%s3601_s6 + $0x60] sm:$0xff] }
 0x45a   :  { %v369_v61 = vrot.slane %v347_v19, %v2998_v47  ;;  %v486_v33 = vsel %vm115_vm2, %v464_v20, 0.0  ;;  %v466_v34 = vmul.f32 %v404_v21, %v3056_v24  ;;  %v412_v29 = vrot.slane %v331_v22, %v3007_v55  ;;  %v3125_v20 = vld [vmem:[%s3601_s6 + $0x68] sm:$0xff] }
 0x45b   :  { %v2977_v35 = vpop.eup %2566  ;;  %v489_v38 = vsel %vm115_vm2, %v465_v27, 0.0  ;;  %v467_v40 = vmul.f32 %v408_v28, %v3065_v32  ;;  %v377_v43 = vcombine.high %v355_v30, %v355_v30 }
 0x45c   :  { %v1551_v23 = vsel %vm115_vm2, %v2977_v35, 0.0  ;;  %v420_v18 = vrot.slane %v369_v61, %v3007_v55  ;;  %v492_v48 = vsel %vm115_vm2, %v466_v34, 0.0  ;;  %v379_v51 = vcombine.high %v369_v61, %v369_v61  ;;  %v3141_v61 = vld [vmem:[%s3601_s6 + $0x78] sm:$0xff] }
 0x45d   :  { %v2981_v36 = vpop.eup %2568  ;;  %1552 = vadd.xlane.f32.xlu0 %v1551_v23  ;;  %v346_v23 = vrot.slane %v332_v13, %v2998_v47  ;;  %v495_v56 = vsel %vm115_vm2, %v467_v40, 0.0  ;;  %v424_v0 = vrot.slane %v377_v43, %v3007_v55  ;;  %v2532_v43 = vpop.permute.xlu1 %2531 }
 0x45e   :  { %v1554_v37 = vsel %vm115_vm2, %v2981_v36, 0.0  ;;  %v428_v4 = vrot.slane %v379_v51, %v3007_v55 }
 0x45f   :  { %1555 = vadd.xlane.f32.xlu1 %v1554_v37  ;;  %v3075_v37 = vld [vmem:[%s3601_s6 + $0x38] sm:$0xff]  ;;  %v362_v63 = vrot.slane %v346_v23, %v2998_v47  ;;  %v471_v5 = vmul.f32 %v424_v0, %v3100_v2 }
 0x460   :  { %v468_v49 = vmul.f32 %v412_v29, %v3075_v37  ;;  %v472_v6 = vmul.f32 %v428_v4, %v3109_v7 }
 0x461   :  { %v432_v41 = vrot.slane %v362_v63, %v3007_v55  ;;  %v507_v21 = vsel %vm115_vm2, %v471_v5, 0.0 }
 0x462   :  { %v498_v3 = vsel %vm115_vm2, %v468_v49, 0.0  ;;  %v510_v27 = vsel %vm115_vm2, %v472_v6, 0.0 }
 0x463   :  { %v473_v22 = vmul.f32 %v432_v41, %v3117_v12 }
 0x470   :  { %2541 = vrot.lane.b32.xlu1 %v2944_v58, %s2605_s22  ;;  %v388_v58 = vrot.slane %v320_v53, %v3007_v55  ;;  %v348_v53 = vcombine.high %v346_v23, %v346_v23 }
 0x472   :  { %v462_v1 = vmul.f32 %v388_v58, %v3014_v62  ;;  %v376_v39 = vrot.slane %v348_v53, %v2998_v47  ;;  %v2534_v53 = vunpack.i.h.bf16 %v2532_v43 }
 0x473   :  { %2546 = vrot.lane.b32.xlu0 %v2545_v42, %s2598_s15  ;;  %v416_v42 = vrot.slane %v355_v30, %v3007_v55 }
 0x474   :  { %v480_v11 = vsel %vm115_vm2, %v462_v1, 0.0  ;;  %v470_v1 = vmul.f32 %v420_v18, %v3091_v54  ;;  %v380_v19 = vcombine.high %v376_v39, %v376_v39 }
 0x475   :  { %v469_v58 = vmul.f32 %v416_v42, %v3083_v44  ;;  %v2537_v42 = vpop.permute.xlu0 %2536 }
 0x476   :  { %v504_v57 = vsel %vm115_vm2, %v470_v1, 0.0  ;;  %v444_v30 = vrot.slane %v380_v19, %v3007_v55  ;;  %v2539_v51 = vunpack.i.h.bf16 %v2537_v42 }
 0x477   :  { %v501_v9 = vsel %vm115_vm2, %v469_v58, 0.0  ;;  %v2533_v58 = vunpack.i.l.bf16 %v2532_v43 }
 0x478   :  { %v476_v23 = vmul.f32 %v444_v30, %v3141_v61  ;;  %v1130_v4 = vsel %vm115_vm2, %v2534_v53, %v2539_v51 }
 0x47a   :  { %v522_v40 = vsel %vm115_vm2, %v476_v23, 0.0 }
 0x492   :  { %481 = vadd.xlane.f32.xlu0 %v480_v11  ;;  %v378_v11 = vcombine.high %v362_v63, %v362_v63 }
 0x494   :  { %478 = vadd.xlane.f32.xlu1 %v477_v17  ;;  %v436_v17 = vrot.slane %v376_v39, %v3007_v55  ;;  %v440_v13 = vrot.slane %v378_v11, %v3007_v55 }
 0x496   :  { %484 = vadd.xlane.f32.xlu0 %v483_v25  ;;  %v3133_v25 = vld [vmem:[%s3601_s6 + $0x70] sm:$0xff]  ;;  %v474_v28 = vmul.f32 %v436_v17, %v3125_v20  ;;  %s2607_s6 = smov 72  }
 0x497   :  { %v475_v34 = vmul.f32 %v440_v13, %v3133_v25 }
 0x498   :  { %487 = vadd.xlane.f32.xlu1 %v486_v33  ;;  %v513_v33 = vsel %vm115_vm2, %v473_v22, 0.0  ;;  %v516_v29 = vsel %vm115_vm2, %v474_v28, 0.0 }
 0x49a   :  { %490 = vadd.xlane.f32.xlu0 %v489_v38  ;;  %v519_v38 = vsel %vm115_vm2, %v475_v34, 0.0 }
 0x49c   :  { %493 = vadd.xlane.f32.xlu1 %v492_v48 }
 0x49e   :  { %496 = vadd.xlane.f32.xlu0 %v495_v56  ;;  %v2538_v56 = vunpack.i.l.bf16 %v2537_v42 }
 0x4a0   :  { %499 = vadd.xlane.f32.xlu1 %v498_v3  ;;  %v1129_v39 = vsel %vm115_vm2, %v2533_v58, %v2538_v56 }
 0x4a2   :  { %502 = vadd.xlane.f32.xlu0 %v501_v9 }
 0x4a4   :  { %505 = vadd.xlane.f32.xlu1 %v504_v57 }
 0x4a6   :  { %508 = vadd.xlane.f32.xlu0 %v507_v21 }
 0x4a8   :  { %511 = vadd.xlane.f32.xlu1 %v510_v27 }
 0x4aa   :  { %514 = vadd.xlane.f32.xlu0 %v513_v33 }
 0x4ac   :  { %517 = vadd.xlane.f32.xlu1 %v516_v29 }
 0x4ae   :  { %520 = vadd.xlane.f32.xlu0 %v519_v38 }
 0x4b0   :  { %523 = vadd.xlane.f32.xlu1 %v522_v40 }
 0x4c1   :  { %1893 = vrot.lane.b32.xlu1 %v2905_v50, %s2601_s14 }
 0x4c4   :  { %1895 = vrot.lane.b32.xlu0 %v2908_v52, %s2601_s14 }
 0x4da   :  { %v659_v18 = vpop.xlane.xlu0 %658 }
 0x4db   :  { %2570 = vrcp.f32 %v659_v18 }
 0x4dc   :  { %v662_v48 = vpop.xlane.xlu1 %661 }
 0x4dd   :  { %2572 = vrcp.f32 %v662_v48 }
 0x4e2   :  { %v1107_v49 = vpop.xlane.xlu0 %1106 }
 0x4e3   :  { %2574 = vrcp.f32 %v1107_v49 }
 0x4e4   :  { %v1110_v0 = vpop.xlane.xlu1 %1109 }
 0x4e5   :  { %v2571_v63 = vpop.eup %2570  ;;  %2576 = vrcp.f32 %v1110_v0 }
 0x4e6   :  { %v665_v3 = vmul.f32 %v2571_v63, %v2958_v60  ;;  %v1132_v60 = vpack.c.bf16 %v1130_v4, %v1129_v39 }
 0x4e7   :  { %v2573_v1 = vpop.eup %2572 }
 0x4e8   :  { %v3157_v9 = vmul.f32 %v2573_v1, %v2962_v16  ;;  %v740_v5 = vrot.slane %v665_v3, %v2998_v47  ;;  %v733_v41 = vcombine.high %v665_v3, %v665_v3 }
 0x4ea   :  { %v1553_v11 = vpop.xlane.xlu0 %1552  ;;  %v685_v57 = vpack.c.bf16 %v3157_v9, %v665_v3  ;;  %v756_v6 = vrot.slane %v740_v5, %v2998_v47  ;;  %v748_v17 = vcombine.high %v740_v5, %v740_v5  ;;  %v747_v19 = vrot.slane %v733_v41, %v2998_v47 }
 0x4eb   :  { %2578 = vrcp.f32 %v1553_v11  ;;  %v789_v21 = vrot.slane %v3157_v9, %v2998_v47 }
 0x4ec   :  { %v1556_v22 = vpop.xlane.xlu1 %1555  ;;  %2400 = vmatmul.mubr.msk.bf16.vlgmr.msra.gmra.mrb[4].mxu0 %vm115_vm2, %v685_v57  ;;  %v834_v16 = vrot.slane %v756_v6, %v3007_v55  ;;  %v770_v13 = vrot.slane %v748_v17, %v2998_v47  ;;  %v778_v27 = vcombine.high %v756_v6, %v756_v6  ;;  %v763_v28 = vrot.slane %v747_v19, %v2998_v47 }
 0x4ed   :  { %v2575_v30 = vpop.eup %2574  ;;  %2580 = vrcp.f32 %v1556_v22  ;;  %2410 = vmatpush3.bf16.msra.mxu0 %v1132_v60  ;;  %2411 = vmatprep.mubr.msk.bf16.mxu0 %vm2600_vm1, %v2599_v15  ;;  %v749_v33 = vcombine.high %v747_v19, %v747_v19  ;;  %v3172_v34 = vrot.slane %v789_v21, %v2998_v47  ;;  %v797_v29 = vcombine.high %v789_v21, %v789_v21 }
 0x4ee   :  { %v3175_v23 = vmul.f32 %v2575_v30, %v2966_v26  ;;  %v2547_v38 = vpop.permute.xlu0 %2546  ;;  %v911_v40 = vmul.f32 %v834_v16, %v3020_v59  ;;  %v838_v42 = vrot.slane %v770_v13, %v3007_v55  ;;  %v842_v43 = vrot.slane %v778_v27, %v3007_v55  ;;  %2421 = vmatprep.subr.bf16.mxu0 %v2599_v15 }
 0x4ef   :  { %v2577_v18 = vpop.eup %2576  ;;  %v2549_v48 = vunpack.i.h.bf16 %v2547_v38  ;;  %v2548_v49 = vunpack.i.l.bf16 %v2547_v38  ;;  %v780_v51 = vcombine.high %v770_v13, %v770_v13  ;;  %v850_v53 = vrot.slane %v763_v28, %v3007_v55 }
 0x4f0   :  { %v3183_v56 = vmul.f32 %v2577_v18, %v2970_v31  ;;  %v2542_v26 = vpop.permute.xlu1 %2541  ;;  %v927_v58 = vsel %vm115_vm2, %v911_v40, 0.0  ;;  %v912_v0 = vmul.f32 %v838_v42, %v3014_v62  ;;  %v913_v63 = vmul.f32 %v842_v43, %v3029_v8 }
 0x4f1   :  { %v2544_v3 = vunpack.i.h.bf16 %v2542_v26  ;;  %v2543_v1 = vunpack.i.l.bf16 %v2542_v26  ;;  %928 = vadd.xlane.f32.xlu0 %v927_v58  ;;  %v846_v4 = vrot.slane %v780_v51, %v3007_v55  ;;  %v915_v31 = vmul.f32 %v850_v53, %v3047_v14 }
 0x4f2   :  { %v930_v39 = vsel %vm115_vm2, %v912_v0, 0.0  ;;  %v1131_v5 = vpack.c.bf16 %v3183_v56, %v3175_v23  ;;  %v777_v41 = vrot.slane %v749_v33, %v2998_v47  ;;  %v933_v6 = vsel %vm115_vm2, %v913_v63, 0.0 }
 0x4f3   :  { %v1576_v11 = vsel %vm115_vm2, %v2544_v3, %v2549_v48  ;;  %v1575_v57 = vsel %vm115_vm2, %v2543_v1, %v2548_v49  ;;  %931 = vadd.xlane.f32.xlu1 %v930_v39  ;;  %v914_v17 = vmul.f32 %v846_v4, %v3038_v10  ;;  %v866_v21 = vrot.slane %v3172_v34, %v3007_v55 }
 0x4f4   :  { %v1578_v19 = vpack.c.bf16 %v1576_v11, %v1575_v57  ;;  %2412 = vmatmul.mubr.msk.bf16.vlgmr.msra.gmra.mrb[8].mxu0 %vm115_vm2, %v1131_v5  ;;  %v854_v60 = vrot.slane %v777_v41, %v3007_v55  ;;  %v819_v22 = vrot.slane %v797_v29, %v2998_v47  ;;  %v779_v13 = vcombine.high %v763_v28, %v763_v28 }
 0x4f5   :  { %v2579_v16 = vpop.eup %2578  ;;  %934 = vadd.xlane.f32.xlu0 %v933_v6  ;;  %2423 = vmatprep.mubr.msk.bf16.mxu0 %vm2600_vm1, %v2599_v15  ;;  %v781_v27 = vcombine.high %v777_v41, %v777_v41  ;;  %v936_v30 = vsel %vm115_vm2, %v914_v17, 0.0  ;;  %v782_v40 = vcombine.high %v3157_v9, %v3157_v9  ;;  %v939_v29 = vsel %vm115_vm2, %v915_v31, 0.0 }
 0x4f6   :  { %2422 = vmatpush3.bf16.msra.mxu0 %v1578_v19  ;;  %v916_v33 = vmul.f32 %v854_v60, %v3056_v24  ;;  %v870_v38 = vrot.slane %v819_v22, %v3007_v55  ;;  %v827_v43 = vcombine.high %v3172_v34, %v3172_v34  ;;  %v3214_v15 = vmul.f32 %v2579_v16, %v2977_v35 }
 0x4f7   :  { %v2581_v42 = vpop.eup %2580  ;;  %937 = vadd.xlane.f32.xlu1 %v936_v30  ;;  %v919_v18 = vmul.f32 %v866_v21, %v3083_v44  ;;  %v858_v48 = vrot.slane %v779_v13, %v3007_v55  ;;  %v862_v9 = vrot.slane %v781_v27, %v3007_v55  ;;  %v829_v49 = vcombine.high %v819_v22, %v819_v22 }
 0x4f8   :  { %v3217_v28 = vmul.f32 %v2581_v42, %v2981_v36  ;;  %v942_v51 = vsel %vm115_vm2, %v916_v33, 0.0  ;;  %v920_v34 = vmul.f32 %v870_v38, %v3091_v54  ;;  %v796_v35 = vrot.slane %v782_v40, %v2998_v47 }
 0x4f9   :  { %940 = vadd.xlane.f32.xlu0 %v939_v29  ;;  %v874_v36 = vrot.slane %v827_v43, %v3007_v55  ;;  %v951_v26 = vsel %vm115_vm2, %v919_v18, 0.0  ;;  %v917_v58 = vmul.f32 %v858_v48, %v3065_v32  ;;  %v918_v3 = vmul.f32 %v862_v9, %v3075_v37 }
 0x4fa   :  { %v1577_v53 = vpack.c.bf16 %v3217_v28, %v3214_v15  ;;  %v812_v0 = vrot.slane %v796_v35, %v2998_v47  ;;  %v798_v63 = vcombine.high %v796_v35, %v796_v35  ;;  %v1186_v1 = vrot.slane %v3175_v23, %v2998_v47 }
 0x4fb   :  { %943 = vadd.xlane.f32.xlu1 %v942_v51  ;;  %v954_v4 = vsel %vm115_vm2, %v920_v34, 0.0  ;;  %v878_v39 = vrot.slane %v829_v49, %v3007_v55  ;;  %v945_v31 = vsel %vm115_vm2, %v917_v58, 0.0  ;;  %v921_v41 = vmul.f32 %v874_v36, %v3100_v2 }
 0x4fc   :  { %2424 = vmatmul.mubr.msk.bf16.vlgmr.msra.gmra.mrb[12].mxu0 %vm115_vm2, %v1577_v53  ;;  %v826_v5 = vrot.slane %v798_v63, %v2998_v47  ;;  %v882_v11 = vrot.slane %v812_v0, %v3007_v55  ;;  %v828_v57 = vcombine.high %v812_v0, %v812_v0  ;;  %v948_v6 = vsel %vm115_vm2, %v918_v3, 0.0 }
 0x4fd   :  { %952 = vadd.xlane.f32.xlu0 %v951_v26  ;;  %v1194_v17 = vcombine.high %v1186_v1, %v1186_v1  ;;  %v922_v19 = vmul.f32 %v878_v39, %v3109_v7  ;;  %v1179_v22 = vcombine.high %v3175_v23, %v3175_v23  ;;  %v957_v16 = vsel %vm115_vm2, %v921_v41, 0.0 }
 0x4fe   :  { %v886_v60 = vrot.slane %v826_v5, %v3007_v55  ;;  %v830_v21 = vcombine.high %v826_v5, %v826_v5  ;;  %v923_v13 = vmul.f32 %v882_v11, %v3117_v12  ;;  %v890_v27 = vrot.slane %v828_v57, %v3007_v55 }
 0x4ff   :  { %955 = vadd.xlane.f32.xlu1 %v954_v4  ;;  %v1202_v30 = vrot.slane %v1186_v1, %v2998_v47  ;;  %v1216_v33 = vrot.slane %v1194_v17, %v2998_v47  ;;  %v960_v38 = vsel %vm115_vm2, %v922_v19, 0.0  ;;  %v1193_v23 = vrot.slane %v1179_v22, %v2998_v47 }
 0x500   :  { %v924_v40 = vmul.f32 %v886_v60, %v3125_v20  ;;  %v894_v42 = vrot.slane %v830_v21, %v3007_v55  ;;  %v963_v29 = vsel %vm115_vm2, %v923_v13, 0.0  ;;  %v925_v43 = vmul.f32 %v890_v27, %v3133_v25 }
 0x501   :  { %946 = vadd.xlane.f32.xlu0 %v945_v31  ;;  %v1280_v18 = vrot.slane %v1202_v30, %v3007_v55  ;;  %v1224_v48 = vcombine.high %v1202_v30, %v1202_v30  ;;  %v1284_v9 = vrot.slane %v1216_v33, %v3007_v55  ;;  %v1235_v49 = vrot.slane %v3183_v56, %v2998_v47 }
 0x502   :  { %v966_v51 = vsel %vm115_vm2, %v924_v40, 0.0  ;;  %v926_v53 = vmul.f32 %v894_v42, %v3141_v61  ;;  %v1226_v34 = vcombine.high %v1216_v33, %v1216_v33  ;;  %v1195_v35 = vcombine.high %v1193_v23, %v1193_v23 }
 0x503   :  { %949 = vadd.xlane.f32.xlu1 %v948_v6  ;;  %v969_v36 = vsel %vm115_vm2, %v925_v43, 0.0  ;;  %v1357_v26 = vmul.f32 %v1280_v18, %v3020_v59  ;;  %v1288_v58 = vrot.slane %v1224_v48, %v3007_v55  ;;  %v1209_v0 = vrot.slane %v1193_v23, %v2998_v47 }
 0x504   :  { %v1358_v63 = vmul.f32 %v1284_v9, %v3014_v62  ;;  %v972_v3 = vsel %vm115_vm2, %v926_v53, 0.0  ;;  %v1292_v1 = vrot.slane %v1226_v34, %v3007_v55  ;;  %v1223_v4 = vrot.slane %v1195_v35, %v2998_v47 }
 0x505   :  { %958 = vadd.xlane.f32.xlu0 %v957_v16  ;;  %v1243_v39 = vcombine.high %v1235_v49, %v1235_v49  ;;  %v1373_v5 = vsel %vm115_vm2, %v1357_v26, 0.0  ;;  %v1359_v31 = vmul.f32 %v1288_v58, %v3029_v8  ;;  %v1296_v41 = vrot.slane %v1209_v0, %v3007_v55 }
 0x506   :  { %v1251_v11 = vrot.slane %v1235_v49, %v2998_v47  ;;  %v1228_v57 = vcombine.high %v3183_v56, %v3183_v56  ;;  %v1376_v6 = vsel %vm115_vm2, %v1358_v63, 0.0  ;;  %v1360_v17 = vmul.f32 %v1292_v1, %v3038_v10 }
 0x507   :  { %961 = vadd.xlane.f32.xlu1 %v960_v38  ;;  %v1300_v19 = vrot.slane %v1223_v4, %v3007_v55  ;;  %v1265_v60 = vrot.slane %v1243_v39, %v2998_v47  ;;  %v1379_v21 = vsel %vm115_vm2, %v1359_v31, 0.0  ;;  %v1361_v22 = vmul.f32 %v1296_v41, %v3047_v14 }
 0x508   :  { %v1312_v16 = vrot.slane %v1251_v11, %v3007_v55  ;;  %v1225_v13 = vcombine.high %v1209_v0, %v1209_v0  ;;  %v3285_v27 = vand.u32 127, %v287_v45  ;;  %v1227_v56 = vcombine.high %v1223_v4, %v1223_v4 }
 0x509   :  { %964 = vadd.xlane.f32.xlu0 %v963_v29  ;;  %v1382_v30 = vsel %vm115_vm2, %v1360_v17, 0.0  ;;  %v1362_v33 = vmul.f32 %v1300_v19, %v3056_v24  ;;  %v1316_v38 = vrot.slane %v1265_v60, %v3007_v55  ;;  %v1242_v40 = vrot.slane %v1228_v57, %v2998_v47 }
 0x50a   :  { %v1385_v42 = vsel %vm115_vm2, %v1361_v22, 0.0  ;;  %v1365_v23 = vmul.f32 %v1312_v16, %v3083_v44  ;;  %v1304_v29 = vrot.slane %v1225_v13, %v3007_v55  ;;  %v1273_v43 = vcombine.high %v1251_v11, %v1251_v11 }
 0x50b   :  { %967 = vadd.xlane.f32.xlu1 %v966_v51  ;;  %v1308_v45 = vrot.slane %v1227_v56, %v3007_v55  ;;  %v1275_v18 = vcombine.high %v1265_v60, %v1265_v60  ;;  %v1388_v48 = vsel %vm115_vm2, %v1362_v33, 0.0  ;;  %v1935_v9 = vadd.s32 4294967264, %v3285_v27 }
 0x50c   :  { %v1366_v49 = vmul.f32 %v1316_v38, %v3091_v54  ;;  %v1244_v51 = vcombine.high %v1242_v40, %v1242_v40  ;;  %v1258_v53 = vrot.slane %v1242_v40, %v2998_v47  ;;  %v1397_v34 = vsel %vm115_vm2, %v1365_v23, 0.0 }
 0x50d   :  { %970 = vadd.xlane.f32.xlu0 %v969_v36  ;;  %v1363_v35 = vmul.f32 %v1304_v29, %v3065_v32  ;;  %v1320_v36 = vrot.slane %v1273_v43, %v3007_v55  ;;  %v1364_v26 = vmul.f32 %v1308_v45, %v3075_v37  ;;  %v1324_v58 = vrot.slane %v1275_v18, %v3007_v55 }
 0x50e   :  { %v1632_v0 = vrot.slane %v3214_v15, %v2998_v47  ;;  %v3307_v63 = vsub.s32 %v1935_v9, %v2995_v46  ;;  %v1272_v1 = vrot.slane %v1244_v51, %v2998_v47  ;;  %v1328_v39 = vrot.slane %v1258_v53, %v3007_v55 }
 0x50f   :  { %973 = vadd.xlane.f32.xlu1 %v972_v3  ;;  %v1400_v3 = vsel %vm115_vm2, %v1366_v49, 0.0  ;;  %v1391_v31 = vsel %vm115_vm2, %v1363_v35, 0.0  ;;  %v1367_v41 = vmul.f32 %v1320_v36, %v3100_v2  ;;  %v1394_v57 = vsel %vm115_vm2, %v1364_v26, 0.0 }
 0x510   :  { %v1640_v17 = vcombine.high %v1632_v0, %v1632_v0  ;;  %v1625_v19 = vcombine.high %v3214_v15, %v3214_v15  ;;  %v1332_v22 = vrot.slane %v1272_v1, %v3007_v55  ;;  %v1276_v16 = vcombine.high %v1272_v1, %v1272_v1 }
 0x511   :  { %1374 = vadd.xlane.f32.xlu0 %v1373_v5  ;;  %v1274_v5 = vcombine.high %v1258_v53, %v1258_v53  ;;  %v1369_v56 = vmul.f32 %v1328_v39, %v3117_v12  ;;  %v1403_v15 = vsel %vm115_vm2, %v1367_v41, 0.0  ;;  %v1648_v40 = vrot.slane %v1632_v0, %v2998_v47 }
 0x512   :  { %v1662_v29 = vrot.slane %v1640_v17, %v2998_v47  ;;  %v1639_v43 = vrot.slane %v1625_v19, %v2998_v47  ;;  %v1340_v9 = vrot.slane %v1276_v16, %v3007_v55  ;;  %vm2331_vm1 = vcmask 64512  }
 0x513   :  { %1377 = vadd.xlane.f32.xlu1 %v1376_v6  ;;  %v1368_v6 = vmul.f32 %v1324_v58, %v3109_v7  ;;  %v1409_v51 = vsel %vm115_vm2, %v1369_v56, 0.0  ;;  %v1726_v36 = vrot.slane %v1648_v40, %v3007_v55  ;;  %v1670_v26 = vcombine.high %v1648_v40, %v1648_v40 }
 0x514   :  { %v1730_v0 = vrot.slane %v1662_v29, %v3007_v55  ;;  %v1641_v1 = vcombine.high %v1639_v43, %v1639_v43  ;;  %v1372_v41 = vmul.f32 %v1340_v9, %v3141_v61 }
 0x515   :  { %1380 = vadd.xlane.f32.xlu0 %v1379_v21  ;;  %v1406_v23 = vsel %vm115_vm2, %v1368_v6, 0.0  ;;  %v1655_v6 = vrot.slane %v1639_v43, %v2998_v47 }
 0x516   :  { %v1804_v16 = vmul.f32 %v1730_v0, %v3014_v62  ;;  %v1669_v56 = vrot.slane %v1641_v1, %v2998_v47 }
 0x517   :  { %1383 = vadd.xlane.f32.xlu1 %v1382_v30  ;;  %v1336_v30 = vrot.slane %v1274_v5, %v3007_v55 }
 0x519   :  { %1386 = vadd.xlane.f32.xlu0 %v1385_v42  ;;  %v1371_v53 = vmul.f32 %v1336_v30, %v3133_v25 }
 0x51b   :  { %1389 = vadd.xlane.f32.xlu1 %v1388_v48  ;;  %v1370_v48 = vmul.f32 %v1332_v22, %v3125_v20 }
 0x51d   :  { %1398 = vadd.xlane.f32.xlu0 %v1397_v34 }
 0x51f   :  { %v482_v4 = vpop.xlane.xlu0 %481  ;;  %1401 = vadd.xlane.f32.xlu1 %v1400_v3  ;;  %v1672_v3 = vcombine.high %v1662_v29, %v1662_v29  ;;  %v1742_v29 = vrot.slane %v1655_v6, %v3007_v55 }
 0x520   :  { %v1943_v60 = vrot.slane %v482_v4, %v3307_v63  ;;  %v1681_v4 = vrot.slane %v3217_v28, %v2998_v47 }
 0x521   :  { %1392 = vadd.xlane.f32.xlu0 %v1391_v31  ;;  %v479_v11 = vpop.xlane.xlu1 %478  ;;  %v1412_v31 = vsel %vm115_vm2, %v1370_v48, 0.0  ;;  %v1746_v48 = vrot.slane %v1669_v56, %v3007_v55 }
 0x522   :  { %v1939_v21 = vrot.slane %v479_v11, %v3307_v63 }
 0x523   :  { %v485_v13 = vpop.xlane.xlu0 %484  ;;  %1395 = vadd.xlane.f32.xlu1 %v1394_v57  ;;  %v1415_v57 = vsel %vm115_vm2, %v1371_v53, 0.0  ;;  %v1674_v53 = vcombine.high %v3217_v28, %v3217_v28  ;;  %v1808_v1 = vmul.f32 %v1746_v48, %v3056_v24  ;;  %v1673_v28 = vcombine.high %v1669_v56, %v1669_v56 }
 0x524   :  { %v2001_v33 = vsel %vm2000_vm5, %v1943_v60, %v1939_v21  ;;  %v1947_v38 = vrot.slane %v485_v13, %v3307_v63  ;;  %v1803_v60 = vmul.f32 %v1726_v36, %v3020_v59  ;;  %v1734_v21 = vrot.slane %v1670_v26, %v3007_v55 }
 0x525   :  { %1404 = vadd.xlane.f32.xlu0 %v1403_v15  ;;  %v488_v42 = vpop.xlane.xlu1 %487  ;;  %v1738_v13 = vrot.slane %v1672_v3, %v3007_v55  ;;  %v1689_v15 = vcombine.high %v1681_v4, %v1681_v4  ;;  %v1697_v59 = vrot.slane %v1681_v4, %v2998_v47 }
 0x526   :  { %v2003_v45 = vsel %vm2002_vm6, %v1947_v38, %v2001_v33  ;;  %v1951_v18 = vrot.slane %v488_v42, %v3307_v63  ;;  %v1418_v38 = vsel %vm115_vm2, %v1372_v41, 0.0  ;;  %v1819_v62 = vsel %vm115_vm2, %v1803_v60, 0.0 }
 0x527   :  { %v491_v49 = vpop.xlane.xlu0 %490  ;;  %1407 = vadd.xlane.f32.xlu1 %v1406_v23  ;;  %v1805_v23 = vmul.f32 %v1734_v21, %v3029_v8  ;;  %v1834_v60 = vsel %vm115_vm2, %v1808_v1, 0.0  ;;  %v1754_v21 = vrot.slane %v1673_v28, %v3007_v55 }
 0x528   :  { %v2005_v34 = vsel %vm2004_vm7, %v1951_v18, %v2003_v45  ;;  %v1955_v35 = vrot.slane %v491_v49, %v3307_v63  ;;  %v1822_v45 = vsel %vm115_vm2, %v1804_v16, 0.0  ;;  %v1806_v18 = vmul.f32 %v1738_v13, %v3038_v10 }
 0x529   :  { %1410 = vadd.xlane.f32.xlu0 %v1409_v51  ;;  %v494_v58 = vpop.xlane.xlu1 %493  ;;  %v1711_v51 = vrot.slane %v1689_v15, %v2998_v47  ;;  %v1825_v26 = vsel %vm115_vm2, %v1805_v23, 0.0 }
 0x52a   :  { %v2007_v39 = vsel %vm2006_vm8, %v1955_v35, %v2005_v34  ;;  %v1959_v5 = vrot.slane %v494_v58, %v3307_v63  ;;  %v1758_v34 = vrot.slane %v1697_v59, %v3007_v55  ;;  %v1671_v35 = vcombine.high %v1655_v6, %v1655_v6 }
 0x52b   :  { %v497_v11 = vpop.xlane.xlu0 %496  ;;  %1413 = vadd.xlane.f32.xlu1 %v1412_v31  ;;  %v1807_v58 = vmul.f32 %v1742_v29, %v3047_v14  ;;  %v1828_v3 = vsel %vm115_vm2, %v1806_v18, 0.0  ;;  %v1688_v31 = vrot.slane %v1674_v53, %v2998_v47  ;;  %v1810_v29 = vmul.f32 %v1754_v21, %v3075_v37 }
 0x52c   :  { %v2009_v17 = vsel %vm2008_vm9, %v1959_v5, %v2007_v39  ;;  %v1963_v19 = vrot.slane %v497_v11, %v3307_v63  ;;  %v1762_v5 = vrot.slane %v1711_v51, %v3007_v55  ;;  %v1811_v11 = vmul.f32 %v1758_v34, %v3083_v44 }
 0x52d   :  { %1416 = vadd.xlane.f32.xlu0 %v1415_v57  ;;  %v500_v22 = vpop.xlane.xlu1 %499  ;;  %v1750_v14 = vrot.slane %v1671_v35, %v3007_v55  ;;  %v1831_v24 = vsel %vm115_vm2, %v1807_v58, 0.0  ;;  %v1690_v56 = vcombine.high %v1688_v31, %v1688_v31  ;;  %v1840_v53 = vsel %vm115_vm2, %v1810_v29, 0.0 }
 0x52e   :  { %v2011_v30 = vsel %vm2010_vm10, %v1963_v19, %v2009_v17  ;;  %v1967_v33 = vrot.slane %v500_v22, %v3307_v63  ;;  %v1719_v17 = vcombine.high %v1697_v59, %v1697_v59  ;;  %v1721_v22 = vcombine.high %v1711_v51, %v1711_v51 }
 0x52f   :  { %v503_v40 = vpop.xlane.xlu0 %502  ;;  %1419 = vadd.xlane.f32.xlu1 %v1418_v38  ;;  %v1812_v13 = vmul.f32 %v1762_v5, %v3091_v54  ;;  %v1809_v38 = vmul.f32 %v1750_v14, %v3065_v32  ;;  %v1718_v18 = vrot.slane %v1690_v56, %v2998_v47 }
 0x530   :  { %v3360_v42 = vsel %vm2012_vm11, %v1967_v33, %v2011_v30  ;;  %v1971_v9 = vrot.slane %v503_v40, %v3307_v63  ;;  %v1843_v33 = vsel %vm115_vm2, %v1811_v11, 0.0  ;;  %v1766_v59 = vrot.slane %v1719_v17, %v3007_v55 }
 0x531   :  { %1820 = vadd.xlane.f32.xlu0 %v1819_v62  ;;  %v506_v43 = vpop.xlane.xlu1 %505  ;;  %v1704_v62 = vrot.slane %v1688_v31, %v2998_v47  ;;  %v1770_v54 = vrot.slane %v1721_v22, %v3007_v55  ;;  %v1846_v32 = vsel %vm115_vm2, %v1812_v13, 0.0  ;;  %v1837_v48 = vsel %vm115_vm2, %v1809_v38, 0.0 }
 0x532   :  { %v1975_v49 = vrot.slane %v506_v43, %v3307_v63  ;;  %v1722_v34 = vcombine.high %v1718_v18, %v1718_v18 }
 0x533   :  { %v509_v8 = vpop.xlane.xlu0 %508  ;;  %1823 = vadd.xlane.f32.xlu1 %v1822_v45  ;;  %v1774_v37 = vrot.slane %v1704_v62, %v3007_v55  ;;  %v1720_v51 = vcombine.high %v1704_v62, %v1704_v62 }
 0x534   :  { %v2014_v36 = vsel %vm2000_vm5, %v1975_v49, %v1971_v9  ;;  %v1979_v10 = vrot.slane %v509_v8, %v3307_v63  ;;  %v1813_v49 = vmul.f32 %v1766_v59, %v3100_v2  ;;  %v1778_v8 = vrot.slane %v1718_v18, %v3007_v55 }
 0x535   :  { %1826 = vadd.xlane.f32.xlu0 %v1825_v26  ;;  %v512_v0 = vpop.xlane.xlu1 %511  ;;  %v1815_v35 = vmul.f32 %v1774_v37, %v3117_v12  ;;  %v1786_v26 = vrot.slane %v1722_v34, %v3007_v55 }
 0x536   :  { %v2015_v4 = vsel %vm2002_vm6, %v1979_v10, %v2014_v36  ;;  %v1983_v39 = vrot.slane %v512_v0, %v3307_v63  ;;  %v1849_v47 = vsel %vm115_vm2, %v1813_v49, 0.0  ;;  %v1782_v36 = vrot.slane %v1720_v51, %v3007_v55 }
 0x537   :  { %v515_v41 = vpop.xlane.xlu0 %514  ;;  %1829 = vadd.xlane.f32.xlu1 %v1828_v3  ;;  %v1816_v10 = vmul.f32 %v1778_v8, %v3125_v20  ;;  %v1818_v3 = vmul.f32 %v1786_v26, %v3141_v61  ;;  %v2039_v20 = vadd.s32 4294967256, %v3285_v27 }
 0x538   :  { %v2016_v57 = vsel %vm2004_vm7, %v1983_v39, %v2015_v4  ;;  %v1987_v6 = vrot.slane %v515_v41, %v3307_v63  ;;  %v1817_v58 = vmul.f32 %v1782_v36, %v3133_v25 }
 0x539   :  { %1832 = vadd.xlane.f32.xlu0 %v1831_v24  ;;  %v518_v19 = vpop.xlane.xlu1 %517  ;;  %v1858_v0 = vsel %vm115_vm2, %v1816_v10, 0.0  ;;  %v1864_v1 = vsel %vm115_vm2, %v1818_v3, 0.0  ;;  %v2042_v25 = vsub.s32 %v2039_v20, %v2995_v46 }
 0x53a   :  { %v2017_v16 = vsel %vm2006_vm8, %v1987_v6, %v2016_v57  ;;  %v1991_v44 = vrot.slane %v518_v19, %v3307_v63  ;;  %v1861_v12 = vsel %vm115_vm2, %v1817_v58, 0.0 }
 0x53b   :  { %v521_v30 = vpop.xlane.xlu0 %520  ;;  %1835 = vadd.xlane.f32.xlu1 %v1834_v60 }
 0x53c   :  { %v2018_v15 = vsel %vm2008_vm9, %v1991_v44, %v2017_v16  ;;  %v1995_v40 = vrot.slane %v521_v30, %v3307_v63 }
 0x53d   :  { %1844 = vadd.xlane.f32.xlu0 %v1843_v33  ;;  %v524_v23 = vpop.xlane.xlu1 %523 }
 0x53e   :  { %v2019_v43 = vsel %vm2010_vm10, %v1995_v40, %v2018_v15  ;;  %v1999_v45 = vrot.slane %v524_v23, %v3307_v63  ;;  %v1814_v63 = vmul.f32 %v1770_v54, %v3109_v7  ;;  %v1855_v7 = vsel %vm115_vm2, %v1815_v35, 0.0 }
 0x53f   :  { %1847 = vadd.xlane.f32.xlu1 %v1846_v32  ;;  %v3428_v55 = vpop.permute.xlu0 %1895 }
 0x540   :  { %v3408_v9 = vsel %vm2012_vm11, %v1999_v45, %v2019_v43  ;;  %v1852_v2 = vsel %vm115_vm2, %v1814_v63, 0.0  ;;  %v2136_v63 = vadd.s32 4294967248, %v3285_v27 }
 0x541   :  { %1838 = vadd.xlane.f32.xlu0 %v1837_v48  ;;  %v3430_v28 = vpop.permute.xlu1 %1893 }
 0x542   :  { %v3450_v10 = vsub.s32 %v2136_v63, %v2995_v46 }
 0x543   :  { %1841 = vadd.xlane.f32.xlu1 %v1840_v53 }
 0x545   :  { %1850 = vadd.xlane.f32.xlu0 %v1849_v47 }
 0x547   :  { %1853 = vadd.xlane.f32.xlu1 %v1852_v2 }
 0x549   :  { %1856 = vadd.xlane.f32.xlu0 %v1855_v7 }
 0x54b   :  { %1859 = vadd.xlane.f32.xlu1 %v1858_v0 }
 0x54d   :  { %1862 = vadd.xlane.f32.xlu0 %v1861_v12 }
 0x54f   :  { %1865 = vadd.xlane.f32.xlu1 %v1864_v1 }
 0x57e   :  { %v929_v4 = vpop.xlane.xlu0 %928 }
 0x57f   :  { %v2043_v5 = vrot.slane %v929_v4, %v2042_v25 }
 0x580   :  { %v932_v39 = vpop.xlane.xlu1 %931 }
 0x581   :  { %v2047_v31 = vrot.slane %v932_v39, %v2042_v25 }
 0x582   :  { %v935_v61 = vpop.xlane.xlu0 %934 }
 0x583   :  { %v2104_v41 = vsel %vm2000_vm5, %v2047_v31, %v2043_v5  ;;  %v2051_v11 = vrot.slane %v935_v61, %v2042_v25 }
 0x584   :  { %v938_v14 = vpop.xlane.xlu1 %937 }
 0x585   :  { %v2105_v57 = vsel %vm2002_vm6, %v2051_v11, %v2104_v41  ;;  %v2055_v6 = vrot.slane %v938_v14, %v2042_v25 }
 0x586   :  { %v941_v24 = vpop.xlane.xlu0 %940 }
 0x587   :  { %v2106_v17 = vsel %vm2004_vm7, %v2055_v6, %v2105_v57  ;;  %v2059_v19 = vrot.slane %v941_v24, %v2042_v25 }
 0x588   :  { %v944_v60 = vpop.xlane.xlu1 %943 }
 0x589   :  { %v2107_v21 = vsel %vm2006_vm8, %v2059_v19, %v2106_v17  ;;  %v2063_v22 = vrot.slane %v944_v60, %v2042_v25 }
 0x58a   :  { %v953_v16 = vpop.xlane.xlu0 %952 }
 0x58b   :  { %v2108_v44 = vsel %vm2008_vm9, %v2063_v22, %v2107_v21  ;;  %v2075_v56 = vrot.slane %v953_v16, %v2042_v25 }
 0x58c   :  { %v956_v13 = vpop.xlane.xlu1 %955 }
 0x58d   :  { %v2079_v30 = vrot.slane %v956_v13, %v2042_v25 }
 0x58e   :  { %v947_v33 = vpop.xlane.xlu0 %946 }
 0x58f   :  { %v2111_v38 = vsel %vm2000_vm5, %v2079_v30, %v2075_v56  ;;  %v2067_v15 = vrot.slane %v947_v33, %v2042_v25 }
 0x590   :  { %v950_v40 = vpop.xlane.xlu1 %949 }
 0x591   :  { %v2109_v59 = vsel %vm2010_vm10, %v2067_v15, %v2108_v44  ;;  %v2071_v62 = vrot.slane %v950_v40, %v2042_v25 }
 0x592   :  { %v959_v23 = vpop.xlane.xlu0 %958 }
 0x593   :  { %v3441_v29 = vsel %vm2012_vm11, %v2071_v62, %v2109_v59  ;;  %v2083_v54 = vrot.slane %v959_v23, %v2042_v25 }
 0x594   :  { %v962_v43 = vpop.xlane.xlu1 %961 }
 0x595   :  { %v2112_v45 = vsel %vm2002_vm6, %v2083_v54, %v2111_v38  ;;  %v2087_v32 = vrot.slane %v962_v43, %v2042_v25 }
 0x596   :  { %v965_v18 = vpop.xlane.xlu0 %964 }
 0x597   :  { %v2113_v48 = vsel %vm2004_vm7, %v2087_v32, %v2112_v45  ;;  %v2091_v49 = vrot.slane %v965_v18, %v2042_v25 }
 0x598   :  { %v968_v37 = vpop.xlane.xlu1 %967 }
 0x599   :  { %v2114_v51 = vsel %vm2006_vm8, %v2091_v49, %v2113_v48  ;;  %v2095_v53 = vrot.slane %v968_v37, %v2042_v25 }
 0x59a   :  { %v971_v8 = vpop.xlane.xlu0 %970 }
 0x59b   :  { %v2115_v34 = vsel %vm2008_vm9, %v2095_v53, %v2114_v51  ;;  %v2099_v47 = vrot.slane %v971_v8, %v2042_v25 }
 0x59c   :  { %v974_v35 = vpop.xlane.xlu1 %973 }
 0x59d   :  { %v2116_v36 = vsel %vm2010_vm10, %v2099_v47, %v2115_v34  ;;  %v2103_v2 = vrot.slane %v974_v35, %v2042_v25 }
 0x59e   :  { %v1375_v26 = vpop.xlane.xlu0 %1374 }
 0x59f   :  { %v3453_v7 = vsel %vm2012_vm11, %v2103_v2, %v2116_v36  ;;  %v2140_v0 = vrot.slane %v1375_v26, %v3450_v10 }
 0x5a0   :  { %v1378_v58 = vpop.xlane.xlu1 %1377 }
 0x5a1   :  { %v2144_v3 = vrot.slane %v1378_v58, %v3450_v10 }
 0x5a2   :  { %v1381_v12 = vpop.xlane.xlu0 %1380 }
 0x5a3   :  { %v2201_v1 = vsel %vm2000_vm5, %v2144_v3, %v2140_v0  ;;  %v2148_v20 = vrot.slane %v1381_v12, %v3450_v10 }
 0x5a4   :  { %v1384_v4 = vpop.xlane.xlu1 %1383 }
 0x5a5   :  { %v2202_v25 = vsel %vm2002_vm6, %v2148_v20, %v2201_v1  ;;  %v2152_v39 = vrot.slane %v1384_v4, %v3450_v10 }
 0x5a6   :  { %v1387_v5 = vpop.xlane.xlu0 %1386 }
 0x5a7   :  { %v2203_v31 = vsel %vm2004_vm7, %v2152_v39, %v2202_v25  ;;  %v2156_v61 = vrot.slane %v1387_v5, %v3450_v10  ;;  %v2233_v39 = vadd.s32 4294967240, %v3285_v27 }
 0x5a8   :  { %v1390_v41 = vpop.xlane.xlu1 %1389 }
 0x5a9   :  { %v2204_v11 = vsel %vm2006_vm8, %v2156_v61, %v2203_v31  ;;  %v2160_v14 = vrot.slane %v1390_v41, %v3450_v10 }
 0x5aa   :  { %v1399_v57 = vpop.xlane.xlu0 %1398 }
 0x5ab   :  { %v2205_v6 = vsel %vm2008_vm9, %v2160_v14, %v2204_v11  ;;  %v2172_v17 = vrot.slane %v1399_v57, %v3450_v10  ;;  %v3501_v11 = vsub.s32 %v2233_v39, %v2995_v46 }
 0x5ac   :  { %v1402_v24 = vpop.xlane.xlu1 %1401 }
 0x5ad   :  { %v2176_v19 = vrot.slane %v1402_v24, %v3450_v10 }
 0x5ae   :  { %v1393_v60 = vpop.xlane.xlu0 %1392 }
 0x5af   :  { %v2208_v21 = vsel %vm2000_vm5, %v2176_v19, %v2172_v17  ;;  %v2164_v22 = vrot.slane %v1393_v60, %v3450_v10 }
 0x5b0   :  { %v1396_v16 = vpop.xlane.xlu1 %1395 }
 0x5b1   :  { %v2206_v44 = vsel %vm2010_vm10, %v2164_v22, %v2205_v6  ;;  %v2168_v13 = vrot.slane %v1396_v16, %v3450_v10 }
 0x5b2   :  { %v1405_v18 = vpop.xlane.xlu0 %1404 }
 0x5b3   :  { %v3473_v56 = vsel %vm2012_vm11, %v2168_v13, %v2206_v44  ;;  %v2180_v5 = vrot.slane %v1405_v18, %v3450_v10 }
 0x5b4   :  { %v1408_v48 = vpop.xlane.xlu1 %1407 }
 0x5b5   :  { %v2184_v41 = vrot.slane %v1408_v48, %v3450_v10  ;;  %v2209_v14 = vsel %vm2002_vm6, %v2180_v5, %v2208_v21 }
 0x5b6   :  { %v1411_v49 = vpop.xlane.xlu0 %1410 }
 0x5b7   :  { %v2188_v6 = vrot.slane %v1411_v49, %v3450_v10  ;;  %v2210_v17 = vsel %vm2004_vm7, %v2184_v41, %v2209_v14 }
 0x5b8   :  { %v1414_v37 = vpop.xlane.xlu1 %1413 }
 0x5b9   :  { %v2192_v16 = vrot.slane %v1414_v37, %v3450_v10  ;;  %v2211_v44 = vsel %vm2006_vm8, %v2188_v6, %v2210_v17 }
 0x5ba   :  { %v1417_v51 = vpop.xlane.xlu0 %1416 }
 0x5bc   :  { %v3483_v53 = vpop.xlane.xlu1 %1419 }
 0x5be   :  { %v1821_v63 = vpop.xlane.xlu0 %1820 }
 0x5bf   :  { %v724_v30 = vpop.f32.mrb[4].mxu0  ;;  %v2237_v27 = vrot.slane %v1821_v63, %v3501_v11 }
 0x5c0   :  { %1899 = vrot.lane.b32.xlu1 %v724_v30, %s2607_s6  ;;  %1869 = vrot.lane.b32.xlu0 %v724_v30, %s2598_s15  ;;  %v2401_v33 = vpop.f32.mrb[5].mxu0  ;;  %v1824_v8 = vpop.xlane.xlu1 %1823 }
 0x5c1   :  { %v727_v38 = vpop.f32.mrb[6].mxu0  ;;  %v2241_v57 = vrot.slane %v1824_v8, %v3501_v11 }
 0x5c2   :  { %v2402_v15 = vpop.f32.mrb[7].mxu0  ;;  %v1827_v34 = vpop.xlane.xlu0 %1826 }
 0x5c3   :  { %v2245_v19 = vrot.slane %v1827_v34, %v3501_v11  ;;  %v2298_v46 = vsel %vm2000_vm5, %v2241_v57, %v2237_v27  ;;  %v2200_v57 = vrot.slane %v3483_v53, %v3450_v10 }
 0x5c4   :  { %1901 = vrot.lane.b32.xlu0 %v727_v38, %s2607_s6  ;;  %1871 = vrot.lane.b32.xlu1 %v727_v38, %s2598_s15  ;;  %s2608_s15 = smov 120   ;;  %v1830_v47 = vpop.xlane.xlu1 %1829  ;;  %v2196_v38 = vrot.slane %v1417_v51, %v3450_v10 }
 0x5c5   :  { %v2249_v33 = vrot.slane %v1830_v47, %v3501_v11  ;;  %v2299_v15 = vsel %vm2002_vm6, %v2245_v19, %v2298_v46 }
 0x5c6   :  { %v1833_v35 = vpop.xlane.xlu0 %1832 }
 0x5c7   :  { %v1170_v40 = vpop.f32.mrb[8].mxu0 }
 0x5c8   :  { %1877 = vrot.lane.b32.xlu1 %v1170_v40, %s2603_s21  ;;  %v2413_v59 = vpop.f32.mrb[9].mxu0  ;;  %v3485_v36 = vpop.xlane.xlu1 %1835 }
 0x5c9   :  { %v1173_v62 = vpop.f32.mrb[10].mxu0  ;;  %v2257_v51 = vrot.slane %v3485_v36, %v3501_v11 }
 0x5ca   :  { %1879 = vrot.lane.b32.xlu0 %v1173_v62, %s2603_s21  ;;  %v2414_v23 = vpop.f32.mrb[11].mxu0  ;;  %v1845_v2 = vpop.xlane.xlu0 %1844 }
 0x5cb   :  { %v2269_v13 = vrot.slane %v1845_v2, %v3501_v11  ;;  %v2212_v23 = vsel %vm2008_vm9, %v2192_v16, %v2211_v44 }
 0x5cc   :  { %1905 = vrot.lane.b32.xlu1 %v1170_v40, %s2604_s2  ;;  %v1848_v26 = vpop.xlane.xlu1 %1847  ;;  %v2213_v48 = vsel %vm2010_vm10, %v2196_v38, %v2212_v23 }
 0x5cd   :  { %v2273_v60 = vrot.slane %v1848_v26, %v3501_v11  ;;  %v2214_v19 = vsel %vm2012_vm11, %v2200_v57, %v2213_v48 }
 0x5ce   :  { %1907 = vrot.lane.b32.xlu0 %v1173_v62, %s2604_s2  ;;  %v3487_v58 = vpop.xlane.xlu0 %1838 }
 0x5cf   :  { %v1616_v54 = vpop.f32.mrb[12].mxu0  ;;  %v2305_v40 = vsel %vm2000_vm5, %v2273_v60, %v2269_v13  ;;  %v2261_v2 = vrot.slane %v3487_v58, %v3501_v11 }
 0x5d0   :  { %1885 = vrot.lane.b32.xlu1 %v1616_v54, %s2601_s14  ;;  %v2425_v43 = vpop.f32.mrb[13].mxu0  ;;  %v3489_v0 = vpop.xlane.xlu1 %1841 }
 0x5d1   :  { %v1619_v45 = vpop.f32.mrb[14].mxu0  ;;  %v2253_v43 = vrot.slane %v1833_v35, %v3501_v11 }
 0x5d2   :  { %1887 = vrot.lane.b32.xlu0 %v1619_v45, %s2601_s14  ;;  %v2426_v32 = vpop.f32.mrb[15].mxu0  ;;  %v1851_v3 = vpop.xlane.xlu0 %1850 }
 0x5d3   :  { %v2277_v21 = vrot.slane %v1851_v3, %v3501_v11  ;;  %v2300_v32 = vsel %vm2004_vm7, %v2249_v33, %v2299_v15 }
 0x5d4   :  { %1911 = vrot.lane.b32.xlu1 %v1616_v54, %s2608_s15  ;;  %v1854_v12 = vpop.xlane.xlu1 %1853  ;;  %v2301_v8 = vsel %vm2006_vm8, %v2253_v43, %v2300_v32 }
 0x5d5   :  { %v2281_v59 = vrot.slane %v1854_v12, %v3501_v11  ;;  %v2306_v54 = vsel %vm2002_vm6, %v2277_v21, %v2305_v40 }
 0x5d6   :  { %1913 = vrot.lane.b32.xlu0 %v1619_v45, %s2608_s15  ;;  %v1857_v1 = vpop.xlane.xlu0 %1856 }
 0x5d7   :  { %v2285_v18 = vrot.slane %v1857_v1, %v3501_v11  ;;  %v2307_v49 = vsel %vm2004_vm7, %v2281_v59, %v2306_v54 }
 0x5d8   :  { %v3491_v20 = vpop.xlane.xlu1 %1859 }
 0x5d9   :  { %v2289_v34 = vrot.slane %v3491_v20, %v3501_v11  ;;  %v2308_v26 = vsel %vm2006_vm8, %v2285_v18, %v2307_v49  ;;  %v2302_v20 = vsel %vm2008_vm9, %v2257_v51, %v2301_v8 }
 0x5da   :  { %v3493_v4 = vpop.xlane.xlu0 %1862 }
 0x5db   :  { %v2293_v58 = vrot.slane %v3493_v4, %v3501_v11  ;;  %v2303_v4 = vsel %vm2010_vm10, %v2261_v2, %v2302_v20 }
 0x5dc   :  { %v3495_v25 = vpop.xlane.xlu1 %1865 }
 0x5dd   :  { %v2297_v6 = vrot.slane %v3495_v25, %v3501_v11 }
 0x632   :  { %v1900_v31 = vpop.permute.xlu1 %1899  ;;  %v1870_v61 = vpop.permute.xlu0 %1869 }
 0x633   :  { %v2314_v63 = vsel %vm115_vm2, %v2905_v50, %v1870_v61  ;;  %v2309_v61 = vsel %vm2008_vm9, %v2289_v34, %v2308_v26 }
 0x634   :  { %v2310_v53 = vsel %vm2010_vm10, %v2293_v58, %v2309_v61 }
 0x635   :  { %v2311_v16 = vsel %vm2012_vm11, %v2297_v6, %v2310_v53 }
 0x636   :  { %v1872_v24 = vpop.permute.xlu1 %1871  ;;  %v1902_v22 = vpop.permute.xlu0 %1901 }
 0x637   :  { %v2315_v36 = vsel %vm115_vm2, %v2908_v52, %v1872_v24  ;;  %v2265_v52 = vrot.slane %v3489_v0, %v3501_v11  ;;  %vm2341_vm2 = vcmask 457728  }
 0x639   :  { %v2304_v25 = vsel %vm2012_vm11, %v2265_v52, %v2303_v4 }
 0x63a   :  { %v1878_v30 = vpop.permute.xlu1 %1877 }
 0x63b   :  { %v2317_v47 = vsel %vm2316_vm12, %v2314_v63, %v1878_v30 }
 0x63c   :  { %v1880_v62 = vpop.permute.xlu0 %1879 }
 0x63d   :  { %v2318_v3 = vsel %vm2316_vm12, %v2315_v36, %v1880_v62 }
 0x63e   :  { %v1906_v45 = vpop.permute.xlu1 %1905 }
 0x640   :  { %v1908_v37 = vpop.permute.xlu0 %1907 }
 0x642   :  { %v1886_v35 = vpop.permute.xlu1 %1885 }
 0x643   :  { %v2320_v50 = vsel %vm2319_vm13, %v2317_v47, %v1886_v35 }
 0x644   :  { %v2323_v12 = vsel %vm2322_vm14, %v2320_v50, %v3430_v28  ;;  %v1888_v1 = vpop.permute.xlu0 %1887 }
 0x645   :  { %v2326_v39 = vsel %vm2325_vm15, %v2323_v12, %v1900_v31  ;;  %v2321_v5 = vsel %vm2319_vm13, %v2318_v3, %v1888_v1 }
 0x646   :  { %v2329_v41 = vsel %vm2328_vm0, %v2326_v39, %v1906_v45  ;;  %v2324_v28 = vsel %vm2322_vm14, %v2321_v5, %v3428_v55  ;;  %v1912_v14 = vpop.permute.xlu1 %1911 }
 0x647   :  { %2344 = vst [vmem:[%s3602_s7] sm:$0xff] %v2329_v41  ;;  %v2327_v31 = vsel %vm2325_vm15, %v2324_v28, %v1902_v22  ;;  %v2332_v0 = vsel %vm2331_vm1, %v1906_v45, %v1912_v14 }
 0x648   :  { %v2330_v24 = vsel %vm2328_vm0, %v2327_v31, %v1908_v37  ;;  %v2334_v55 = vsel %vm2316_vm12, %v2332_v0, %v3360_v42  ;;  %v1914_v10 = vpop.permute.xlu0 %1913 }
 0x649   :  { %2346 = vst [vmem:[%s3602_s7 + $0x10] sm:$0xff] %v2330_v24  ;;  %v2337_v17 = vsel %vm2336_vm3, %v2334_v55, %v3441_v29  ;;  %v2333_v27 = vsel %vm2331_vm1, %v1908_v37, %v1914_v10 }
 0x64a   :  { %v2339_v11 = vsel %vm2319_vm13, %v2337_v17, %v3473_v56  ;;  %v2335_v42 = vsel %vm2316_vm12, %v2333_v27, %v3408_v9 }
 0x64b   :  { %v2342_v60 = vsel %vm2341_vm2, %v2339_v11, %v2304_v25  ;;  %v2338_v22 = vsel %vm2336_vm3, %v2335_v42, %v3453_v7 }
 0x64c   :  { %2345 = vst.msk [vmem:[%s3602_s7 + $0x8] sm:$0xff] %vm2322_vm14, %v2342_v60  ;;  %v2340_v29 = vsel %vm2319_vm13, %v2338_v22, %v2214_v19 }
 0x64d   :  { %v2343_v56 = vsel %vm2341_vm2, %v2340_v29, %v2311_v16 }
 0x64e   :  { %2347 = vst.msk [vmem:[%s3602_s7 + $0x18] sm:$0xff] %vm2322_vm14, %v2343_v56 }

</bundles_post_ra>
